<compile_context>
chip_gen: v7x
topology: tpu7x:2x2x1
jax: 0.10.0
libtpu: 0.0.40
codegen_flags: <defaults>
</compile_context>

<pallas_src>
import numpy as np
import jax
import jax.numpy as jnp
from jax.experimental import pallas as pl
from jax.experimental.pallas import tpu as pltpu

# ---- scaled-down model dims (same structure as the PyTorch module) ----
B = 2          # batch
L = 64         # sequence length        (orig 512)
C_IN = 128     # input channels         (orig 768)
C1 = 128       # conv1 out channels     (orig 850)
C2 = 128       # conv2 out channels     (orig 960)
D1 = 128       # linear width           (orig 919)
K = 8          # conv kernel size
POOL = 4       # MaxPool1d(4, 4)

L1 = L - K + 1          # conv1 output length (57)
P = L1 // POOL          # pooled length (14)
PW = P * POOL           # conv1 rows consumed by floor pooling (56)
L2 = P - K + 1          # conv2 output length (7)   (orig 119)

BL = B * L              # batch-folded conv1 input rows (128)
NH = BL - (K - 1)       # conv1 tap-fold rows (121); rows b*L+t, t<=55 are used
PBLK = 16               # per-batch pooled block rows (>= P, multiple of 8)
NPOOL = B * PBLK        # batch-folded pooled rows (32)
NG = NPOOL - (K - 1)    # conv2 tap-fold rows (25);  rows b*16+q, q<L2 valid
NF = (B - 1) * PBLK + 1  # linear2 timestep-fold rows (17); rows b*16 valid


def kmer_kernel(x_ref, w1_ref, b1_ref, sel_ref, w2_ref, b2_ref,
                wl1_ref, bl1_ref, wl2_ref, bl2_ref, out_ref):
    # ---- conv1: ONE wide matmul (B*L, C_IN) @ (C_IN, K*C1) + tap fold -------
    # y1[:, k*C1:(k+1)*C1] = x @ w1[k];  h[r] = sum_k y1[r+k, k-block]
    y1 = jnp.dot(x_ref[...], w1_ref[...],
                 preferred_element_type=jnp.float32)          # (BL, K*C1) f32
    hfold = y1[0:NH, 0:C1]
    for k in range(1, K):
        hfold = hfold + y1[k:k + NH, k * C1:(k + 1) * C1]     # (NH, C1)
    h = jnp.maximum(hfold + b1_ref[...], 0.0)                 # bias + ReLU, f32
    hb = h.astype(jnp.bfloat16)
    # pad to BL rows so the pooling selection matmul is fully (8,128) aligned
    hb = jnp.concatenate(
        [hb, jnp.zeros((BL - NH, C1), jnp.bfloat16)], axis=0)  # (BL, C1)

    # ---- MaxPool1d(4,4): ONE 0/1-selection matmul + 3 aligned maxima --------
    # sel[j*NPOOL + b*PBLK + q, b*L + 4q + j] = 1  (built in the wrapper)
    psel = jnp.dot(sel_ref[...], hb,
                   preferred_element_type=jnp.float32)         # (POOL*NPOOL, C1)
    pooled = psel[0:NPOOL, :]
    for j in range(1, POOL):
        pooled = jnp.maximum(pooled, psel[j * NPOOL:(j + 1) * NPOOL, :])
    pooled = pooled.astype(jnp.bfloat16)                       # (NPOOL, C1)
    # drop1: identity at inference.
    # TODO(synk): training-mode dropout masking (p=0.2 / p=0.5) not implemented.

    # ---- conv2: ONE wide matmul (NPOOL, C1) @ (C1, K*C2) + tap fold ---------
    y2 = jnp.dot(pooled, w2_ref[...],
                 preferred_element_type=jnp.float32)           # (NPOOL, K*C2)
    gfold = y2[0:NG, 0:C2]
    for k in range(1, K):
        gfold = gfold + y2[k:k + NG, k * C2:(k + 1) * C2]      # (NG, C2)
    g = jnp.maximum(gfold + b2_ref[...], 0.0)                  # bias + ReLU, f32
    # drop2: identity at inference.

    # ---- linear1: ONE matmul on the batch-folded rows -----------------------
    z = jnp.dot(g.astype(jnp.bfloat16), wl1_ref[...],
                preferred_element_type=jnp.float32) + bl1_ref[...]   # (NG, D1)

    # ---- reshape(B,-1) + linear2: ONE wide matmul + timestep fold -----------
    # a[r, t*D1:(t+1)*D1] = z[r] @ wl2[t];  out[b] = sum_t a[b*PBLK + t, t-block]
    a = jnp.dot(z.astype(jnp.bfloat16), wl2_ref[...],
                preferred_element_type=jnp.float32)            # (NG, L2*D1)
    ofold = a[0:NF, 0:D1]
    for t in range(1, L2):
        ofold = ofold + a[t:t + NF, t * D1:(t + 1) * D1]       # (NF, D1)
    out = jnp.concatenate(
        [ofold[b * PBLK:b * PBLK + 1, :] for b in range(B)], axis=0)  # (B, D1)
    out_ref[...] = out + bl2_ref[...]                          # lane-dense store


def _pool_selection_matrix():
    """0/1 bf16 matrix: row j*NPOOL + b*PBLK + q picks conv1 row b*L + 4q + j."""
    sel = np.zeros((POOL * NPOOL, BL), np.float32)
    for j in range(POOL):
        for b in range(B):
            for q in range(P):
                sel[j * NPOOL + b * PBLK + q, b * L + POOL * q + j] = 1.0
    return jnp.asarray(sel, jnp.bfloat16)


@jax.jit
def kmer_classifier(x, w1, b1, w2, b2, wl1, bl1, wl2, bl2):
    # Wrapper-side layout plumbing (free): batch-fold + bf16-cast x, fold conv
    # weights into the wide (C_in, K*C_out) form, lane-concat the linear2 weight.
    x2 = x.reshape(BL, C_IN).astype(jnp.bfloat16)
    w1w = jnp.transpose(w1, (1, 0, 2)).reshape(C_IN, K * C1).astype(jnp.bfloat16)
    w2w = jnp.transpose(w2, (1, 0, 2)).reshape(C1, K * C2).astype(jnp.bfloat16)
    wl1b = wl1.astype(jnp.bfloat16)
    wl2w = jnp.transpose(wl2, (1, 0, 2)).reshape(D1, L2 * D1).astype(jnp.bfloat16)
    sel = _pool_selection_matrix()

    return pl.pallas_call(
        kmer_kernel,
        out_shape=jax.ShapeDtypeStruct((B, D1), jnp.float32),
        grid=(1,),                                  # batch folded into M; single step
        in_specs=[
            pl.BlockSpec((BL, C_IN), lambda i: (0, 0)),            # x (bf16, folded)
            pl.BlockSpec((C_IN, K * C1), lambda i: (0, 0)),        # conv1 wide weight
            pl.BlockSpec((1, C1), lambda i: (0, 0)),               # conv1 bias
            pl.BlockSpec((POOL * NPOOL, BL), lambda i: (0, 0)),    # pool selection
            pl.BlockSpec((C1, K * C2), lambda i: (0, 0)),          # conv2 wide weight
            pl.BlockSpec((1, C2), lambda i: (0, 0)),               # conv2 bias
            pl.BlockSpec((C2, D1), lambda i: (0, 0)),              # linear1 weight
            pl.BlockSpec((1, D1), lambda i: (0, 0)),               # linear1 bias
            pl.BlockSpec((D1, L2 * D1), lambda i: (0, 0)),         # linear2 weight (wide)
            pl.BlockSpec((1, D1), lambda i: (0, 0)),               # linear2 bias
        ],
        out_specs=pl.BlockSpec((B, D1), lambda i: (0, 0)),
        compiler_params=pltpu.CompilerParams(
            dimension_semantics=("arbitrary",)),
        # Scaled-up configs: add vmem_limit_bytes and pl.Buffered(1) weight specs.
    )(x2, w1w, b1, sel, w2w, b2, wl1b, bl1, wl2w, bl2)


def reference(x, w1, b1, w2, b2, wl1, bl1, wl2, bl2):
    """Pure-JAX reference with matching bf16-operand / f32-accumulate numerics."""
    xb = x.astype(jnp.bfloat16)
    h = jnp.zeros((B, PW, C1), jnp.float32)
    for k in range(K):
        h += jnp.einsum('blc,cd->bld', xb[:, k:k + PW, :],
                        w1[k].astype(jnp.bfloat16),
                        preferred_element_type=jnp.float32)
    h = jax.nn.relu(h + b1)
    pooled = jnp.max(h.reshape(B, P, POOL, C1), axis=2).astype(jnp.bfloat16)
    g = jnp.zeros((B, L2, C2), jnp.float32)
    for k in range(K):
        g += jnp.einsum('blc,cd->bld', pooled[:, k:k + L2, :],
                        w2[k].astype(jnp.bfloat16),
                        preferred_element_type=jnp.float32)
    g = jax.nn.relu(g + b2)
    z = jnp.einsum('blc,cd->bld', g.astype(jnp.bfloat16),
                   wl1.astype(jnp.bfloat16),
                   preferred_element_type=jnp.float32) + bl1
    zf = z.reshape(B, L2 * D1).astype(jnp.bfloat16)
    return jnp.dot(zf, wl2.reshape(L2 * D1, D1).astype(jnp.bfloat16),
                   preferred_element_type=jnp.float32) + bl2


if __name__ == "__main__":
    key = jax.random.PRNGKey(0)
    ks = jax.random.split(key, 9)
    # Deterministic synthetic parameters (channels-last storage; see header note).
    x   = jax.random.normal(ks[0], (B, L, C_IN), jnp.float32)
    w1  = jax.random.normal(ks[1], (K, C_IN, C1), jnp.float32) * 0.05
    b1  = jax.random.normal(ks[2], (1, C1), jnp.float32) * 0.05
    w2  = jax.random.normal(ks[3], (K, C1, C2), jnp.float32) * 0.05
    b2  = jax.random.normal(ks[4], (1, C2), jnp.float32) * 0.05
    wl1 = jax.random.normal(ks[5], (C2, D1), jnp.float32) * 0.05
    bl1 = jax.random.normal(ks[6], (1, D1), jnp.float32) * 0.05
    wl2 = jax.random.normal(ks[7], (L2, D1, D1), jnp.float32) * 0.05
    bl2 = jax.random.normal(ks[8], (1, D1), jnp.float32) * 0.05

    out = jax.block_until_ready(
        kmer_classifier(x, w1, b1, w2, b2, wl1, bl1, wl2, bl2))
    ref = reference(x, w1, b1, w2, b2, wl1, bl1, wl2, bl2)

    assert out.shape == (B, D1), out.shape
    # Both paths cast operands to bf16 at identical points with f32 accumulation;
    # residual differences are f32 summation-order noise only.
    assert jnp.allclose(out, ref, rtol=1e-2, atol=1e-2), \
        float(jnp.max(jnp.abs(out - ref)))
    print("KERNEL_OK")
</pallas_src>

<mosaic_0001>
module attributes {stable_mosaic.version = 11 : i64} {
  func.func @kmer_kernel(%arg0: i32, %arg1: memref<128x128xbf16, #tpu.memory_space<vmem>>, %arg2: memref<128x1024xbf16, #tpu.memory_space<vmem>>, %arg3: memref<1x128xf32, #tpu.memory_space<vmem>>, %arg4: memref<128x128xbf16, #tpu.memory_space<vmem>>, %arg5: memref<128x1024xbf16, #tpu.memory_space<vmem>>, %arg6: memref<1x128xf32, #tpu.memory_space<vmem>>, %arg7: memref<128x128xbf16, #tpu.memory_space<vmem>>, %arg8: memref<1x128xf32, #tpu.memory_space<vmem>>, %arg9: memref<128x896xbf16, #tpu.memory_space<vmem>>, %arg10: memref<1x128xf32, #tpu.memory_space<vmem>>, %arg11: memref<2x128xf32, #tpu.memory_space<vmem>>) attributes {dimension_semantics = [#tpu.dimension_semantics<arbitrary>], iteration_bounds = array<i64: 1>, scalar_prefetch = 0 : i64, scratch_operands = 0 : i64, tpu.core_type = #tpu.core_type<tc>, window_params = [{pipeline_mode = #tpu.pipeline_mode<synchronous>, transform_indices = @transform_0, window_bounds = array<i64: 128, 128>}, {pipeline_mode = #tpu.pipeline_mode<synchronous>, transform_indices = @transform_1, window_bounds = array<i64: 128, 1024>}, {pipeline_mode = #tpu.pipeline_mode<synchronous>, transform_indices = @transform_2, window_bounds = array<i64: 1, 128>}, {pipeline_mode = #tpu.pipeline_mode<synchronous>, transform_indices = @transform_3, window_bounds = array<i64: 128, 128>}, {pipeline_mode = #tpu.pipeline_mode<synchronous>, transform_indices = @transform_4, window_bounds = array<i64: 128, 1024>}, {pipeline_mode = #tpu.pipeline_mode<synchronous>, transform_indices = @transform_5, window_bounds = array<i64: 1, 128>}, {pipeline_mode = #tpu.pipeline_mode<synchronous>, transform_indices = @transform_6, window_bounds = array<i64: 128, 128>}, {pipeline_mode = #tpu.pipeline_mode<synchronous>, transform_indices = @transform_7, window_bounds = array<i64: 1, 128>}, {pipeline_mode = #tpu.pipeline_mode<synchronous>, transform_indices = @transform_8, window_bounds = array<i64: 128, 896>}, {pipeline_mode = #tpu.pipeline_mode<synchronous>, transform_indices = @transform_9, window_bounds = array<i64: 1, 128>}, {pipeline_mode = #tpu.pipeline_mode<synchronous>, transform_indices = @transform_10, window_bounds = array<i64: 2, 128>}]} {
    %c0 = arith.constant 0 : index
    %c0_0 = arith.constant 0 : index
    %0 = vector.load %arg1[%c0, %c0_0] : memref<128x128xbf16, #tpu.memory_space<vmem>>, vector<128x128xbf16>
    %c0_1 = arith.constant 0 : index
    %c0_2 = arith.constant 0 : index
    %1 = vector.load %arg2[%c0_1, %c0_2] : memref<128x1024xbf16, #tpu.memory_space<vmem>>, vector<128x1024xbf16>
    %cst = arith.constant dense<0.000000e+00> : vector<128x1024xf32>
    %2 = tpu.matmul %0, %1, %cst {dimension_numbers = #tpu.dot_dimension_numbers<[1], [0], [0], [1], [0, 0, 1, 1], [], []>} : vector<128x128xbf16>, vector<128x1024xbf16>, vector<128x1024xf32> -> vector<128x1024xf32>
    %3 = vector.extract_strided_slice %2 {offsets = [0, 0], sizes = [121, 128], strides = [1, 1]} : vector<128x1024xf32> to vector<121x128xf32>
    %4 = vector.extract_strided_slice %2 {offsets = [1, 128], sizes = [121, 128], strides = [1, 1]} : vector<128x1024xf32> to vector<121x128xf32>
    %5 = arith.addf %3, %4 : vector<121x128xf32>
    %6 = vector.extract_strided_slice %2 {offsets = [2, 256], sizes = [121, 128], strides = [1, 1]} : vector<128x1024xf32> to vector<121x128xf32>
    %7 = arith.addf %5, %6 : vector<121x128xf32>
    %8 = vector.extract_strided_slice %2 {offsets = [3, 384], sizes = [121, 128], strides = [1, 1]} : vector<128x1024xf32> to vector<121x128xf32>
    %9 = arith.addf %7, %8 : vector<121x128xf32>
    %10 = vector.extract_strided_slice %2 {offsets = [4, 512], sizes = [121, 128], strides = [1, 1]} : vector<128x1024xf32> to vector<121x128xf32>
    %11 = arith.addf %9, %10 : vector<121x128xf32>
    %12 = vector.extract_strided_slice %2 {offsets = [5, 640], sizes = [121, 128], strides = [1, 1]} : vector<128x1024xf32> to vector<121x128xf32>
    %13 = arith.addf %11, %12 : vector<121x128xf32>
    %14 = vector.extract_strided_slice %2 {offsets = [6, 768], sizes = [121, 128], strides = [1, 1]} : vector<128x1024xf32> to vector<121x128xf32>
    %15 = arith.addf %13, %14 : vector<121x128xf32>
    %16 = vector.extract_strided_slice %2 {offsets = [7, 896], sizes = [121, 128], strides = [1, 1]} : vector<128x1024xf32> to vector<121x128xf32>
    %17 = arith.addf %15, %16 : vector<121x128xf32>
    %c0_3 = arith.constant 0 : index
    %c0_4 = arith.constant 0 : index
    %18 = vector.load %arg3[%c0_3, %c0_4] : memref<1x128xf32, #tpu.memory_space<vmem>>, vector<1x128xf32>
    %19 = vector.broadcast %18 : vector<1x128xf32> to vector<121x128xf32>
    %20 = arith.addf %17, %19 : vector<121x128xf32>
    %cst_5 = arith.constant 0.000000e+00 : f32
    %21 = vector.broadcast %cst_5 : f32 to vector<121x128xf32>
    %22 = arith.maximumf %20, %21 : vector<121x128xf32>
    %23 = arith.truncf %22 : vector<121x128xf32> to vector<121x128xbf16>
    %cst_6 = arith.constant 0.000000e+00 : bf16
    %24 = vector.broadcast %cst_6 : bf16 to vector<7x128xbf16>
    %25 = tpu.concatenate %23, %24 in 0 : vector<121x128xbf16>, vector<7x128xbf16> -> vector<128x128xbf16>
    %c0_7 = arith.constant 0 : index
    %c0_8 = arith.constant 0 : index
    %26 = vector.load %arg4[%c0_7, %c0_8] : memref<128x128xbf16, #tpu.memory_space<vmem>>, vector<128x128xbf16>
    %cst_9 = arith.constant dense<0.000000e+00> : vector<128x128xf32>
    %27 = tpu.matmul %26, %25, %cst_9 {dimension_numbers = #tpu.dot_dimension_numbers<[1], [0], [0], [1], [0, 0, 1, 1], [], []>} : vector<128x128xbf16>, vector<128x128xbf16>, vector<128x128xf32> -> vector<128x128xf32>
    %28 = vector.extract_strided_slice %27 {offsets = [0, 0], sizes = [32, 128], strides = [1, 1]} : vector<128x128xf32> to vector<32x128xf32>
    %29 = vector.extract_strided_slice %27 {offsets = [32, 0], sizes = [32, 128], strides = [1, 1]} : vector<128x128xf32> to vector<32x128xf32>
    %30 = arith.maximumf %28, %29 : vector<32x128xf32>
    %31 = vector.extract_strided_slice %27 {offsets = [64, 0], sizes = [32, 128], strides = [1, 1]} : vector<128x128xf32> to vector<32x128xf32>
    %32 = arith.maximumf %30, %31 : vector<32x128xf32>
    %33 = vector.extract_strided_slice %27 {offsets = [96, 0], sizes = [32, 128], strides = [1, 1]} : vector<128x128xf32> to vector<32x128xf32>
    %34 = arith.maximumf %32, %33 : vector<32x128xf32>
    %35 = arith.truncf %34 : vector<32x128xf32> to vector<32x128xbf16>
    %c0_10 = arith.constant 0 : index
    %c0_11 = arith.constant 0 : index
    %36 = vector.load %arg5[%c0_10, %c0_11] : memref<128x1024xbf16, #tpu.memory_space<vmem>>, vector<128x1024xbf16>
    %cst_12 = arith.constant dense<0.000000e+00> : vector<32x1024xf32>
    %37 = tpu.matmul %35, %36, %cst_12 {dimension_numbers = #tpu.dot_dimension_numbers<[1], [0], [0], [1], [0, 0, 1, 1], [], []>} : vector<32x128xbf16>, vector<128x1024xbf16>, vector<32x1024xf32> -> vector<32x1024xf32>
    %38 = vector.extract_strided_slice %37 {offsets = [0, 0], sizes = [25, 128], strides = [1, 1]} : vector<32x1024xf32> to vector<25x128xf32>
    %39 = vector.extract_strided_slice %37 {offsets = [1, 128], sizes = [25, 128], strides = [1, 1]} : vector<32x1024xf32> to vector<25x128xf32>
    %40 = arith.addf %38, %39 : vector<25x128xf32>
    %41 = vector.extract_strided_slice %37 {offsets = [2, 256], sizes = [25, 128], strides = [1, 1]} : vector<32x1024xf32> to vector<25x128xf32>
    %42 = arith.addf %40, %41 : vector<25x128xf32>
    %43 = vector.extract_strided_slice %37 {offsets = [3, 384], sizes = [25, 128], strides = [1, 1]} : vector<32x1024xf32> to vector<25x128xf32>
    %44 = arith.addf %42, %43 : vector<25x128xf32>
    %45 = vector.extract_strided_slice %37 {offsets = [4, 512], sizes = [25, 128], strides = [1, 1]} : vector<32x1024xf32> to vector<25x128xf32>
    %46 = arith.addf %44, %45 : vector<25x128xf32>
    %47 = vector.extract_strided_slice %37 {offsets = [5, 640], sizes = [25, 128], strides = [1, 1]} : vector<32x1024xf32> to vector<25x128xf32>
    %48 = arith.addf %46, %47 : vector<25x128xf32>
    %49 = vector.extract_strided_slice %37 {offsets = [6, 768], sizes = [25, 128], strides = [1, 1]} : vector<32x1024xf32> to vector<25x128xf32>
    %50 = arith.addf %48, %49 : vector<25x128xf32>
    %51 = vector.extract_strided_slice %37 {offsets = [7, 896], sizes = [25, 128], strides = [1, 1]} : vector<32x1024xf32> to vector<25x128xf32>
    %52 = arith.addf %50, %51 : vector<25x128xf32>
    %c0_13 = arith.constant 0 : index
    %c0_14 = arith.constant 0 : index
    %53 = vector.load %arg6[%c0_13, %c0_14] : memref<1x128xf32, #tpu.memory_space<vmem>>, vector<1x128xf32>
    %54 = vector.broadcast %53 : vector<1x128xf32> to vector<25x128xf32>
    %55 = arith.addf %52, %54 : vector<25x128xf32>
    %cst_15 = arith.constant 0.000000e+00 : f32
    %56 = vector.broadcast %cst_15 : f32 to vector<25x128xf32>
    %57 = arith.maximumf %55, %56 : vector<25x128xf32>
    %58 = arith.truncf %57 : vector<25x128xf32> to vector<25x128xbf16>
    %c0_16 = arith.constant 0 : index
    %c0_17 = arith.constant 0 : index
    %59 = vector.load %arg7[%c0_16, %c0_17] : memref<128x128xbf16, #tpu.memory_space<vmem>>, vector<128x128xbf16>
    %cst_18 = arith.constant dense<0.000000e+00> : vector<25x128xf32>
    %60 = tpu.matmul %58, %59, %cst_18 {dimension_numbers = #tpu.dot_dimension_numbers<[1], [0], [0], [1], [0, 0, 1, 1], [], []>} : vector<25x128xbf16>, vector<128x128xbf16>, vector<25x128xf32> -> vector<25x128xf32>
    %c0_19 = arith.constant 0 : index
    %c0_20 = arith.constant 0 : index
    %61 = vector.load %arg8[%c0_19, %c0_20] : memref<1x128xf32, #tpu.memory_space<vmem>>, vector<1x128xf32>
    %62 = vector.broadcast %61 : vector<1x128xf32> to vector<25x128xf32>
    %63 = arith.addf %60, %62 : vector<25x128xf32>
    %64 = arith.truncf %63 : vector<25x128xf32> to vector<25x128xbf16>
    %c0_21 = arith.constant 0 : index
    %c0_22 = arith.constant 0 : index
    %65 = vector.load %arg9[%c0_21, %c0_22] : memref<128x896xbf16, #tpu.memory_space<vmem>>, vector<128x896xbf16>
    %cst_23 = arith.constant dense<0.000000e+00> : vector<25x896xf32>
    %66 = tpu.matmul %64, %65, %cst_23 {dimension_numbers = #tpu.dot_dimension_numbers<[1], [0], [0], [1], [0, 0, 1, 1], [], []>} : vector<25x128xbf16>, vector<128x896xbf16>, vector<25x896xf32> -> vector<25x896xf32>
    %67 = vector.extract_strided_slice %66 {offsets = [0, 0], sizes = [17, 128], strides = [1, 1]} : vector<25x896xf32> to vector<17x128xf32>
    %68 = vector.extract_strided_slice %66 {offsets = [1, 128], sizes = [17, 128], strides = [1, 1]} : vector<25x896xf32> to vector<17x128xf32>
    %69 = arith.addf %67, %68 : vector<17x128xf32>
    %70 = vector.extract_strided_slice %66 {offsets = [2, 256], sizes = [17, 128], strides = [1, 1]} : vector<25x896xf32> to vector<17x128xf32>
    %71 = arith.addf %69, %70 : vector<17x128xf32>
    %72 = vector.extract_strided_slice %66 {offsets = [3, 384], sizes = [17, 128], strides = [1, 1]} : vector<25x896xf32> to vector<17x128xf32>
    %73 = arith.addf %71, %72 : vector<17x128xf32>
    %74 = vector.extract_strided_slice %66 {offsets = [4, 512], sizes = [17, 128], strides = [1, 1]} : vector<25x896xf32> to vector<17x128xf32>
    %75 = arith.addf %73, %74 : vector<17x128xf32>
    %76 = vector.extract_strided_slice %66 {offsets = [5, 640], sizes = [17, 128], strides = [1, 1]} : vector<25x896xf32> to vector<17x128xf32>
    %77 = arith.addf %75, %76 : vector<17x128xf32>
    %78 = vector.extract_strided_slice %66 {offsets = [6, 768], sizes = [17, 128], strides = [1, 1]} : vector<25x896xf32> to vector<17x128xf32>
    %79 = arith.addf %77, %78 : vector<17x128xf32>
    %80 = vector.extract_strided_slice %79 {offsets = [0, 0], sizes = [1, 128], strides = [1, 1]} : vector<17x128xf32> to vector<1x128xf32>
    %81 = vector.extract_strided_slice %79 {offsets = [16, 0], sizes = [1, 128], strides = [1, 1]} : vector<17x128xf32> to vector<1x128xf32>
    %82 = tpu.concatenate %80, %81 in 0 : vector<1x128xf32>, vector<1x128xf32> -> vector<2x128xf32>
    %c0_24 = arith.constant 0 : index
    %c0_25 = arith.constant 0 : index
    %83 = vector.load %arg10[%c0_24, %c0_25] : memref<1x128xf32, #tpu.memory_space<vmem>>, vector<1x128xf32>
    %84 = vector.broadcast %83 : vector<1x128xf32> to vector<2x128xf32>
    %85 = arith.addf %82, %84 : vector<2x128xf32>
    %c0_26 = arith.constant 0 : index
    %c0_27 = arith.constant 0 : index
    %86 = vector.load %arg11[%c0_26, %c0_27] : memref<2x128xf32, #tpu.memory_space<vmem>>, vector<2x128xf32>
    tpu.vector_store %arg11[%c0_26, %c0_27], %85 {strides = array<i32>} : memref<2x128xf32, #tpu.memory_space<vmem>>, vector<2x128xf32>,
    return
  }
  func.func @transform_0(%arg0: i32) -> (i32, i32) {
    %c0_i32 = arith.constant 0 : i32
    %c0_i32_0 = arith.constant 0 : i32
    %c0_i32_1 = arith.constant 0 : i32
    return %c0_i32, %c0_i32_0 : i32, i32
  }
  func.func @transform_1(%arg0: i32) -> (i32, i32) {
    %c0_i32 = arith.constant 0 : i32
    %c0_i32_0 = arith.constant 0 : i32
    %c0_i32_1 = arith.constant 0 : i32
    return %c0_i32, %c0_i32_0 : i32, i32
  }
  func.func @transform_2(%arg0: i32) -> (i32, i32) {
    %c0_i32 = arith.constant 0 : i32
    %c0_i32_0 = arith.constant 0 : i32
    %c0_i32_1 = arith.constant 0 : i32
    return %c0_i32, %c0_i32_0 : i32, i32
  }
  func.func @transform_3(%arg0: i32) -> (i32, i32) {
    %c0_i32 = arith.constant 0 : i32
    %c0_i32_0 = arith.constant 0 : i32
    %c0_i32_1 = arith.constant 0 : i32
    return %c0_i32, %c0_i32_0 : i32, i32
  }
  func.func @transform_4(%arg0: i32) -> (i32, i32) {
    %c0_i32 = arith.constant 0 : i32
    %c0_i32_0 = arith.constant 0 : i32
    %c0_i32_1 = arith.constant 0 : i32
    return %c0_i32, %c0_i32_0 : i32, i32
  }
  func.func @transform_5(%arg0: i32) -> (i32, i32) {
    %c0_i32 = arith.constant 0 : i32
    %c0_i32_0 = arith.constant 0 : i32
    %c0_i32_1 = arith.constant 0 : i32
    return %c0_i32, %c0_i32_0 : i32, i32
  }
  func.func @transform_6(%arg0: i32) -> (i32, i32) {
    %c0_i32 = arith.constant 0 : i32
    %c0_i32_0 = arith.constant 0 : i32
    %c0_i32_1 = arith.constant 0 : i32
    return %c0_i32, %c0_i32_0 : i32, i32
  }
  func.func @transform_7(%arg0: i32) -> (i32, i32) {
    %c0_i32 = arith.constant 0 : i32
    %c0_i32_0 = arith.constant 0 : i32
    %c0_i32_1 = arith.constant 0 : i32
    return %c0_i32, %c0_i32_0 : i32, i32
  }
  func.func @transform_8(%arg0: i32) -> (i32, i32) {
    %c0_i32 = arith.constant 0 : i32
    %c0_i32_0 = arith.constant 0 : i32
    %c0_i32_1 = arith.constant 0 : i32
    return %c0_i32, %c0_i32_0 : i32, i32
  }
  func.func @transform_9(%arg0: i32) -> (i32, i32) {
    %c0_i32 = arith.constant 0 : i32
    %c0_i32_0 = arith.constant 0 : i32
    %c0_i32_1 = arith.constant 0 : i32
    return %c0_i32, %c0_i32_0 : i32, i32
  }
  func.func @transform_10(%arg0: i32) -> (i32, i32) {
    %c0_i32 = arith.constant 0 : i32
    %c0_i32_0 = arith.constant 0 : i32
    %c0_i32_1 = arith.constant 0 : i32
    return %c0_i32, %c0_i32_0 : i32, i32
  }
}

</mosaic_0001>

<bundles_post_ra>
// kernel: kmer_classifier.1
= control target key start
LH: loop header
LB: loop body
LE: loop exit
PB: predicated region body
PF: predicated region fallthrough
CT: control target
= control target key end

     0   :  { %v3686_v8 = vmov 0   ;;  %s4679_s0 = inlined_call_operand.vmem [shape: bf16[128,128], index: 0, kind: input, shape index: {}]   ;;  %s4680_s1 = inlined_call_operand.vmem [shape: bf16[128,1024], index: 1, kind: input, shape index: {}]   ;;  %s4681_s2 = inlined_call_operand.vmem [shape: f32[1,128], index: 2, kind: input, shape index: {}]   ;;  %s4682_s3 = inlined_call_operand.vmem [shape: bf16[128,128], index: 3, kind: input, shape index: {}]   ;;  %s4683_s4 = inlined_call_operand.vmem [shape: bf16[128,1024], index: 4, kind: input, shape index: {}]   ;;  %s4684_s5 = inlined_call_operand.vmem [shape: f32[1,128], index: 5, kind: input, shape index: {}]   ;;  %s4685_s6 = inlined_call_operand.vmem [shape: bf16[128,128], index: 6, kind: input, shape index: {}]   ;;  %s4686_s7 = inlined_call_operand.vmem [shape: f32[1,128], index: 7, kind: input, shape index: {}]   ;;  %s4687_s8 = inlined_call_operand.vmem [shape: bf16[128,896], index: 8, kind: input, shape index: {}]   ;;  %s4688_s9 = inlined_call_operand.vmem [shape: f32[1,128], index: 9, kind: input, shape index: {}]   ;;  %s4689_s10 = inlined_call_operand.hbm [shape: f32[2,128], index: 10, kind: output, shape index: {}]  }
   0x1   :  { %v53_v0 = vld [vmem:[%s4680_s1] sm:$0xff]  ;;  %v54_v2 = vld [vmem:[%s4680_s1 + $0x8] sm:$0xff]  ;;  %517 = vmatprep.mubr.bf16.mxu0 %v3686_v8  ;;  %630 = vmatprep.mubr.bf16.mxu1 %v3686_v8  ;;  %v55_v63 = vld [vmem:[%s4680_s1 + $0x10] sm:$0xff] }
   0x2   :  { %v57_v1 = vld [vmem:[%s4680_s1 + $0x20] sm:$0xff]  ;;  %v58_v4 = vld [vmem:[%s4680_s1 + $0x28] sm:$0xff] }
   0x3   :  { %v3245_v3 = vcombine.high %v53_v0, %v57_v1  ;;  %v3244_v5 = vcombine.low %v53_v0, %v57_v1  ;;  %v61_v6 = vld [vmem:[%s4680_s1 + $0x40] sm:$0xff]  ;;  %v3247_v9 = vcombine.high %v54_v2, %v58_v4  ;;  %v3246_v10 = vcombine.low %v54_v2, %v58_v4  ;;  %v62_v12 = vld [vmem:[%s4680_s1 + $0x48] sm:$0xff]  ;;  %v59_v0 = vld [vmem:[%s4680_s1 + $0x30] sm:$0xff] }
   0x4   :  { %v65_v7 = vld [vmem:[%s4680_s1 + $0x60] sm:$0xff]  ;;  %v66_v13 = vld [vmem:[%s4680_s1 + $0x68] sm:$0xff]  ;;  %v56_v1 = vld [vmem:[%s4680_s1 + $0x18] sm:$0xff] }
   0x5   :  { %v3253_v11 = vcombine.high %v61_v6, %v65_v7  ;;  %v69_v14 = vld [vmem:[%s4680_s1 + $0x80] sm:$0xff]  ;;  %485 = vmatprep.subr.bf16.mxu0 %v3245_v3  ;;  %v3255_v15 = vcombine.high %v62_v12, %v66_v13  ;;  %v70_v17 = vld [vmem:[%s4680_s1 + $0x88] sm:$0xff]  ;;  %598 = vmatprep.subr.bf16.mxu1 %v3247_v9  ;;  %v3252_v19 = vcombine.low %v61_v6, %v65_v7  ;;  %v60_v2 = vld [vmem:[%s4680_s1 + $0x38] sm:$0xff] }
   0x6   :  { %v73_v16 = vld [vmem:[%s4680_s1 + $0xa0] sm:$0xff]  ;;  %v74_v18 = vld [vmem:[%s4680_s1 + $0xa8] sm:$0xff]  ;;  %486 = vmatpush1.bf16.msra.mxu0 %v3244_v5  ;;  %599 = vmatpush1.bf16.msra.mxu1 %v3246_v10  ;;  %v3254_v20 = vcombine.low %v62_v12, %v66_v13  ;;  %v3249_v6 = vcombine.high %v55_v63, %v59_v0  ;;  %v63_v7 = vld [vmem:[%s4680_s1 + $0x50] sm:$0xff]  ;;  %v3251_v10 = vcombine.high %v56_v1, %v60_v2 }
   0x7   :  { %487 = vmatprep.subr.bf16.mxu0 %v3253_v11  ;;  %v3261_v21 = vcombine.high %v69_v14, %v73_v16  ;;  %600 = vmatprep.subr.bf16.mxu1 %v3255_v15  ;;  %v3263_v22 = vcombine.high %v70_v17, %v74_v18  ;;  %v77_v23 = vld [vmem:[%s4680_s1 + $0xc0] sm:$0xff]  ;;  %v78_v25 = vld [vmem:[%s4680_s1 + $0xc8] sm:$0xff]  ;;  %v3260_v27 = vcombine.low %v69_v14, %v73_v16  ;;  %v67_v9 = vld [vmem:[%s4680_s1 + $0x70] sm:$0xff] }
   0x8   :  { %v81_v24 = vld [vmem:[%s4680_s1 + $0xe0] sm:$0xff]  ;;  %v82_v26 = vld [vmem:[%s4680_s1 + $0xe8] sm:$0xff]  ;;  %v3262_v28 = vcombine.low %v70_v17, %v74_v18  ;;  %v64_v11 = vld [vmem:[%s4680_s1 + $0x58] sm:$0xff]  ;;  %v3248_v13 = vcombine.low %v55_v63, %v59_v0  ;;  %v3250_v16 = vcombine.low %v56_v1, %v60_v2  ;;  %v3257_v17 = vcombine.high %v63_v7, %v67_v9 }
   0x9   :  { %v3269_v29 = vcombine.high %v77_v23, %v81_v24  ;;  %v85_v30 = vld [vmem:[%s4680_s1 + $0x100] sm:$0xff]  ;;  %v3271_v31 = vcombine.high %v78_v25, %v82_v26  ;;  %v86_v33 = vld [vmem:[%s4680_s1 + $0x108] sm:$0xff]  ;;  %v3268_v35 = vcombine.low %v77_v23, %v81_v24  ;;  %v3270_v36 = vcombine.low %v78_v25, %v82_v26  ;;  %v68_v12 = vld [vmem:[%s4680_s1 + $0x78] sm:$0xff] }
   0xa   :  { %488 = vmatpush1.bf16.msra.mxu0 %v3252_v19  ;;  %601 = vmatpush1.bf16.msra.mxu1 %v3254_v20  ;;  %v89_v32 = vld [vmem:[%s4680_s1 + $0x120] sm:$0xff]  ;;  %v90_v34 = vld [vmem:[%s4680_s1 + $0x128] sm:$0xff]  ;;  %v71_v14 = vld [vmem:[%s4680_s1 + $0x90] sm:$0xff]  ;;  %v3259_v20 = vcombine.high %v64_v11, %v68_v12  ;;  %v3258_v25 = vcombine.low %v64_v11, %v68_v12 }
   0xb   :  { %489 = vmatprep.subr.bf16.mxu0 %v3261_v21  ;;  %602 = vmatprep.subr.bf16.mxu1 %v3263_v22  ;;  %v3277_v37 = vcombine.high %v85_v30, %v89_v32  ;;  %v93_v38 = vld [vmem:[%s4680_s1 + $0x140] sm:$0xff]  ;;  %v3279_v39 = vcombine.high %v86_v33, %v90_v34  ;;  %v94_v41 = vld [vmem:[%s4680_s1 + $0x148] sm:$0xff]  ;;  %v3276_v43 = vcombine.low %v85_v30, %v89_v32  ;;  %v75_v15 = vld [vmem:[%s4680_s1 + $0xb0] sm:$0xff] }
   0xc   :  { %v97_v40 = vld [vmem:[%s4680_s1 + $0x160] sm:$0xff]  ;;  %v98_v42 = vld [vmem:[%s4680_s1 + $0x168] sm:$0xff]  ;;  %v3278_v44 = vcombine.low %v86_v33, %v90_v34  ;;  %v72_v18 = vld [vmem:[%s4680_s1 + $0x98] sm:$0xff]  ;;  %v3256_v22 = vcombine.low %v63_v7, %v67_v9  ;;  %v3265_v26 = vcombine.high %v71_v14, %v75_v15  ;;  %v3264_v30 = vcombine.low %v71_v14, %v75_v15 }
   0xd   :  { %v3285_v45 = vcombine.high %v93_v38, %v97_v40  ;;  %v3287_v46 = vcombine.high %v94_v41, %v98_v42  ;;  %v101_v47 = vld [vmem:[%s4680_s1 + $0x180] sm:$0xff]  ;;  %v102_v49 = vld [vmem:[%s4680_s1 + $0x188] sm:$0xff]  ;;  %v3284_v51 = vcombine.low %v93_v38, %v97_v40  ;;  %v3286_v52 = vcombine.low %v94_v41, %v98_v42  ;;  %v76_v19 = vld [vmem:[%s4680_s1 + $0xb8] sm:$0xff] }
   0xe   :  { %490 = vmatpush1.bf16.msra.mxu0 %v3260_v27  ;;  %603 = vmatpush1.bf16.msra.mxu1 %v3262_v28  ;;  %v105_v48 = vld [vmem:[%s4680_s1 + $0x1a0] sm:$0xff]  ;;  %v106_v50 = vld [vmem:[%s4680_s1 + $0x1a8] sm:$0xff]  ;;  %v79_v23 = vld [vmem:[%s4680_s1 + $0xd0] sm:$0xff]  ;;  %v3266_v33 = vcombine.low %v72_v18, %v76_v19 }
   0xf   :  { %491 = vmatprep.subr.bf16.mxu0 %v3269_v29  ;;  %604 = vmatprep.subr.bf16.mxu1 %v3271_v31  ;;  %v3293_v53 = vcombine.high %v101_v47, %v105_v48  ;;  %v3295_v54 = vcombine.high %v102_v49, %v106_v50  ;;  %v109_v55 = vld [vmem:[%s4680_s1 + $0x1c0] sm:$0xff]  ;;  %v110_v57 = vld [vmem:[%s4680_s1 + $0x1c8] sm:$0xff]  ;;  %v3292_v59 = vcombine.low %v101_v47, %v105_v48  ;;  %v83_v24 = vld [vmem:[%s4680_s1 + $0xf0] sm:$0xff] }
  0x10   :  { %v113_v56 = vld [vmem:[%s4680_s1 + $0x1e0] sm:$0xff]  ;;  %v114_v58 = vld [vmem:[%s4680_s1 + $0x1e8] sm:$0xff]  ;;  %v3294_v60 = vcombine.low %v102_v49, %v106_v50  ;;  %v80_v27 = vld [vmem:[%s4680_s1 + $0xd8] sm:$0xff]  ;;  %v3267_v29 = vcombine.high %v72_v18, %v76_v19  ;;  %v3273_v34 = vcombine.high %v79_v23, %v83_v24 }
  0x11   :  { %v3301_v61 = vcombine.high %v109_v55, %v113_v56  ;;  %v3303_v62 = vcombine.high %v110_v57, %v114_v58  ;;  %v3300_v3 = vcombine.low %v109_v55, %v113_v56  ;;  %v3302_v4 = vcombine.low %v110_v57, %v114_v58  ;;  %v3856_v5 = vld [vmem:[%s4679_s0] sm:$0xff]   ;;  %v3889_v21 = vld [vmem:[%s4679_s0 + $0x8] sm:$0xff]   ;;  %v84_v28 = vld [vmem:[%s4680_s1 + $0xf8] sm:$0xff] }
  0x12   :  { %492 = vmatpush1.bf16.msra.mxu0 %v3268_v35  ;;  %605 = vmatpush1.bf16.msra.mxu1 %v3270_v36  ;;  %v87_v31 = vld [vmem:[%s4680_s1 + $0x110] sm:$0xff]  ;;  %v88_v35 = vld [vmem:[%s4680_s1 + $0x118] sm:$0xff]  ;;  %v3274_v42 = vcombine.low %v80_v27, %v84_v28 }
  0x13   :  { %493 = vmatprep.subr.bf16.mxu0 %v3277_v37  ;;  %606 = vmatprep.subr.bf16.mxu1 %v3279_v39  ;;  %v91_v32 = vld [vmem:[%s4680_s1 + $0x130] sm:$0xff]  ;;  %v92_v36 = vld [vmem:[%s4680_s1 + $0x138] sm:$0xff]  ;;  %v3275_v37 = vcombine.high %v80_v27, %v84_v28  ;;  %v3272_v39 = vcombine.low %v79_v23, %v83_v24 }
  0x14   :  { %v3922_v38 = vld [vmem:[%s4679_s0 + $0x10] sm:$0xff]   ;;  %v3280_v47 = vcombine.low %v87_v31, %v91_v32  ;;  %v3282_v50 = vcombine.low %v88_v35, %v92_v36  ;;  %v3955_v55 = vld [vmem:[%s4679_s0 + $0x18] sm:$0xff]  }
  0x15   :  { %v95_v40 = vld [vmem:[%s4680_s1 + $0x150] sm:$0xff] }
  0x16   :  { %494 = vmatpush1.bf16.msra.mxu0 %v3276_v43  ;;  %607 = vmatpush1.bf16.msra.mxu1 %v3278_v44  ;;  %v99_v41 = vld [vmem:[%s4680_s1 + $0x170] sm:$0xff]  ;;  %v3281_v43 = vcombine.high %v87_v31, %v91_v32  ;;  %v96_v44 = vld [vmem:[%s4680_s1 + $0x158] sm:$0xff] }
  0x17   :  { %495 = vmatprep.subr.bf16.mxu0 %v3285_v45  ;;  %608 = vmatprep.subr.bf16.mxu1 %v3287_v46  ;;  %v100_v45 = vld [vmem:[%s4680_s1 + $0x178] sm:$0xff]  ;;  %v3283_v46 = vcombine.high %v88_v35, %v92_v36  ;;  %v103_v48 = vld [vmem:[%s4680_s1 + $0x190] sm:$0xff]  ;;  %v3288_v56 = vcombine.low %v95_v40, %v99_v41 }
  0x18   :  { %v107_v49 = vld [vmem:[%s4680_s1 + $0x1b0] sm:$0xff] }
  0x19   :  { %v111_v57 = vld [vmem:[%s4680_s1 + $0x1d0] sm:$0xff]  ;;  %v3296_v0 = vcombine.low %v103_v48, %v107_v49 }
  0x1a   :  { %496 = vmatpush1.bf16.msra.mxu0 %v3284_v51  ;;  %609 = vmatpush1.bf16.msra.mxu1 %v3286_v52  ;;  %v3289_v51 = vcombine.high %v95_v40, %v99_v41  ;;  %v104_v52 = vld [vmem:[%s4680_s1 + $0x198] sm:$0xff]  ;;  %v115_v58 = vld [vmem:[%s4680_s1 + $0x1f0] sm:$0xff] }
  0x1b   :  { %497 = vmatprep.subr.bf16.mxu0 %v3293_v53  ;;  %610 = vmatprep.subr.bf16.mxu1 %v3295_v54  ;;  %v108_v53 = vld [vmem:[%s4680_s1 + $0x1b8] sm:$0xff]  ;;  %v3291_v54 = vcombine.high %v96_v44, %v100_v45  ;;  %v3305_v2 = vcombine.high %v111_v57, %v115_v58 }
  0x1c   :  { %v3299_v63 = vcombine.high %v104_v52, %v108_v53  ;;  %v3298_v1 = vcombine.low %v104_v52, %v108_v53 }
  0x1e   :  { %498 = vmatpush1.bf16.msra.mxu0 %v3292_v59  ;;  %611 = vmatpush1.bf16.msra.mxu1 %v3294_v60  ;;  %v3290_v59 = vcombine.low %v96_v44, %v100_v45  ;;  %v3297_v60 = vcombine.high %v103_v48, %v107_v49 }
  0x1f   :  { %499 = vmatprep.subr.bf16.mxu0 %v3301_v61  ;;  %612 = vmatprep.subr.bf16.mxu1 %v3303_v62  ;;  %v112_v61 = vld [vmem:[%s4680_s1 + $0x1d8] sm:$0xff] }
  0x20   :  { %v116_v62 = vld [vmem:[%s4680_s1 + $0x1f8] sm:$0xff] }
  0x22   :  { %500 = vmatpush1.bf16.msra.mxu0 %v3300_v3  ;;  %613 = vmatpush1.bf16.msra.mxu1 %v3302_v4  ;;  %v3307_v3 = vcombine.high %v112_v61, %v116_v62  ;;  %v3304_v4 = vcombine.low %v111_v57, %v115_v58 }
  0x23   :  { %711 = vmatprep.subr.bf16.mxu0 %v3249_v6  ;;  %824 = vmatprep.subr.bf16.mxu1 %v3251_v10 }
  0x25   :  { %518 = vmatmul.mubr.bf16.vlgmr.msra.gmra.mrb[0].mxu0 %v3856_v5  ;;  %631 = vmatmul.mubr.bf16.vlgmr.msra.gmra.mrb[0].mxu1 %v3856_v5 }
  0x26   :  { %527 = vmatprep.mubr.bf16.mxu0 %v3686_v8  ;;  %640 = vmatprep.mubr.bf16.mxu1 %v3686_v8 }
  0x27   :  { %712 = vmatpush1.bf16.msra.mxu0 %v3248_v13  ;;  %825 = vmatpush1.bf16.msra.mxu1 %v3250_v16 }
  0x28   :  { %713 = vmatprep.subr.bf16.mxu0 %v3257_v17  ;;  %826 = vmatprep.subr.bf16.mxu1 %v3259_v20 }
  0x2b   :  { %714 = vmatpush1.bf16.msra.mxu0 %v3256_v22  ;;  %827 = vmatpush1.bf16.msra.mxu1 %v3258_v25 }
  0x2c   :  { %715 = vmatprep.subr.bf16.mxu0 %v3265_v26  ;;  %828 = vmatprep.subr.bf16.mxu1 %v3267_v29 }
  0x2d   :  { %528 = vmatmul.mubr.bf16.gmra.mrb[4].mxu0 %v3889_v21  ;;  %641 = vmatmul.mubr.bf16.gmra.mrb[4].mxu1 %v3889_v21 }
  0x2e   :  { %537 = vmatprep.mubr.bf16.mxu0 %v3686_v8  ;;  %650 = vmatprep.mubr.bf16.mxu1 %v3686_v8 }
  0x2f   :  { %716 = vmatpush1.bf16.msra.mxu0 %v3264_v30  ;;  %829 = vmatpush1.bf16.msra.mxu1 %v3266_v33 }
  0x30   :  { %717 = vmatprep.subr.bf16.mxu0 %v3273_v34  ;;  %830 = vmatprep.subr.bf16.mxu1 %v3275_v37 }
  0x33   :  { %718 = vmatpush1.bf16.msra.mxu0 %v3272_v39  ;;  %831 = vmatpush1.bf16.msra.mxu1 %v3274_v42 }
  0x34   :  { %719 = vmatprep.subr.bf16.mxu0 %v3281_v43  ;;  %832 = vmatprep.subr.bf16.mxu1 %v3283_v46 }
  0x35   :  { %538 = vmatmul.mubr.bf16.gmra.mrb[8].mxu0 %v3922_v38  ;;  %651 = vmatmul.mubr.bf16.gmra.mrb[8].mxu1 %v3922_v38 }
  0x36   :  { %547 = vmatprep.mubr.bf16.mxu0 %v3686_v8  ;;  %660 = vmatprep.mubr.bf16.mxu1 %v3686_v8 }
  0x37   :  { %720 = vmatpush1.bf16.msra.mxu0 %v3280_v47  ;;  %833 = vmatpush1.bf16.msra.mxu1 %v3282_v50 }
  0x38   :  { %721 = vmatprep.subr.bf16.mxu0 %v3289_v51  ;;  %834 = vmatprep.subr.bf16.mxu1 %v3291_v54 }
  0x3b   :  { %722 = vmatpush1.bf16.msra.mxu0 %v3288_v56  ;;  %835 = vmatpush1.bf16.msra.mxu1 %v3290_v59 }
  0x3c   :  { %723 = vmatprep.subr.bf16.mxu0 %v3297_v60  ;;  %836 = vmatprep.subr.bf16.mxu1 %v3299_v63 }
  0x3d   :  { %548 = vmatmul.mubr.bf16.gmra.mrb[12].mxu0 %v3955_v55  ;;  %661 = vmatmul.mubr.bf16.gmra.mrb[12].mxu1 %v3955_v55 }
  0x3e   :  { %557 = vmatprep.mubr.bf16.mxu0 %v3686_v8  ;;  %670 = vmatprep.mubr.bf16.mxu1 %v3686_v8 }
  0x3f   :  { %724 = vmatpush1.bf16.msra.mxu0 %v3296_v0 }
  0x40   :  { %15 = vsyncpa [#allocation3], 0  ;;  %837 = vmatpush1.bf16.msra.mxu1 %v3298_v1  ;;  %725 = vmatprep.subr.bf16.mxu0 %v3305_v2  ;;  %v3306_v6 = vcombine.low %v112_v61, %v116_v62  ;;  %v3562_v7 = vld [vmem:[%s4679_s0 + $0x20] sm:$0xff]   ;;  %v3563_v9 = vld [vmem:[%s4679_s0 + $0x28] sm:$0xff]   ;;  %vm953_vm0 = vcmask 1046528   ;;  %vm1033_vm1 = vcmask 1045504  }
  0x41   :  { %838 = vmatprep.subr.bf16.mxu1 %v3307_v3  ;;  %v3564_v10 = vld [vmem:[%s4679_s0 + $0x30] sm:$0xff]   ;;  %v3565_v11 = vld [vmem:[%s4679_s0 + $0x38] sm:$0xff]   ;;  %vm1113_vm2 = vcmask 1044480   ;;  %v3566_v54 = vld [vmem:[%s4682_s3] sm:$0xff]   ;;  %vm1193_vm3 = vcmask 1043456   ;;  %vm1273_vm4 = vcmask 1042432  }
  0x42   :  { %vm1353_vm5 = vcmask 1041408   ;;  %vm1433_vm6 = vcmask 1040384   ;;  %vm1545_vm7 = vsmask.f32 4352 }
  0x43   :  { %726 = vmatpush1.bf16.msra.mxu0 %v3304_v4  ;;  %vm1546_vm8 = vmand %vm1113_vm2, %vm1545_vm7 }
  0x44   :  { %839 = vmatpush1.bf16.msra.mxu1 %v3306_v6 }
  0x45   :  { %558 = vmatmul.mubr.bf16.gmra.mrb[16].mxu0 %v3562_v7  ;;  %671 = vmatmul.mubr.bf16.gmra.mrb[16].mxu1 %v3562_v7 }
  0x46   :  { %567 = vmatprep.mubr.bf16.mxu0 %v3686_v8  ;;  %680 = vmatprep.mubr.bf16.mxu1 %v3686_v8 }
  0x4d   :  { %568 = vmatmul.mubr.bf16.gmra.mrb[20].mxu0 %v3563_v9  ;;  %681 = vmatmul.mubr.bf16.gmra.mrb[20].mxu1 %v3563_v9 }
  0x4e   :  { %577 = vmatprep.mubr.bf16.mxu0 %v3686_v8  ;;  %690 = vmatprep.mubr.bf16.mxu1 %v3686_v8 }
  0x55   :  { %578 = vmatmul.mubr.bf16.gmra.mrb[24].mxu0 %v3564_v10  ;;  %691 = vmatmul.mubr.bf16.gmra.mrb[24].mxu1 %v3564_v10 }
  0x56   :  { %587 = vmatprep.mubr.bf16.mxu0 %v3686_v8  ;;  %700 = vmatprep.mubr.bf16.mxu1 %v3686_v8 }
  0x5d   :  { %588 = vmatmul.mubr.bf16.gmra.mrb[28].mxu0 %v3565_v11  ;;  %701 = vmatmul.mubr.bf16.gmra.mrb[28].mxu1 %v3565_v11 }
  0x5e   :  { %743 = vmatprep.mubr.bf16.mxu0 %v3686_v8  ;;  %856 = vmatprep.mubr.bf16.mxu1 %v3686_v8 }
  0x65   :  { %744 = vmatmul.mubr.bf16.vlgmr.msra.gmra.mrb[32].mxu0 %v3856_v5  ;;  %857 = vmatmul.mubr.bf16.vlgmr.msra.gmra.mrb[32].mxu1 %v3856_v5 }
  0x66   :  { %753 = vmatprep.mubr.bf16.mxu0 %v3686_v8  ;;  %866 = vmatprep.mubr.bf16.mxu1 %v3686_v8 }
  0x6d   :  { %754 = vmatmul.mubr.bf16.gmra.mrb[36].mxu0 %v3889_v21  ;;  %867 = vmatmul.mubr.bf16.gmra.mrb[36].mxu1 %v3889_v21 }
  0x6e   :  { %763 = vmatprep.mubr.bf16.mxu0 %v3686_v8  ;;  %876 = vmatprep.mubr.bf16.mxu1 %v3686_v8 }
  0x75   :  { %764 = vmatmul.mubr.bf16.gmra.mrb[40].mxu0 %v3922_v38  ;;  %877 = vmatmul.mubr.bf16.gmra.mrb[40].mxu1 %v3922_v38 }
  0x76   :  { %773 = vmatprep.mubr.bf16.mxu0 %v3686_v8  ;;  %886 = vmatprep.mubr.bf16.mxu1 %v3686_v8 }
  0x7d   :  { %774 = vmatmul.mubr.bf16.gmra.mrb[44].mxu0 %v3955_v55  ;;  %887 = vmatmul.mubr.bf16.gmra.mrb[44].mxu1 %v3955_v55 }
  0x7e   :  { %783 = vmatprep.mubr.bf16.mxu0 %v3686_v8  ;;  %896 = vmatprep.mubr.bf16.mxu1 %v3686_v8 }
  0x85   :  { %784 = vmatmul.mubr.bf16.gmra.mrb[48].mxu0 %v3562_v7  ;;  %897 = vmatmul.mubr.bf16.gmra.mrb[48].mxu1 %v3562_v7 }
  0x86   :  { %793 = vmatprep.mubr.bf16.mxu0 %v3686_v8  ;;  %906 = vmatprep.mubr.bf16.mxu1 %v3686_v8 }
  0x8d   :  { %794 = vmatmul.mubr.bf16.gmra.mrb[52].mxu0 %v3563_v9  ;;  %907 = vmatmul.mubr.bf16.gmra.mrb[52].mxu1 %v3563_v9 }
  0x8e   :  { %803 = vmatprep.mubr.bf16.mxu0 %v3686_v8  ;;  %916 = vmatprep.mubr.bf16.mxu1 %v3686_v8 }
  0x95   :  { %804 = vmatmul.mubr.bf16.gmra.mrb[56].mxu0 %v3564_v10  ;;  %917 = vmatmul.mubr.bf16.gmra.mrb[56].mxu1 %v3564_v10 }
  0x96   :  { %813 = vmatprep.mubr.bf16.mxu0 %v3686_v8  ;;  %926 = vmatprep.mubr.bf16.mxu1 %v3686_v8 }
  0x9d   :  { %814 = vmatmul.mubr.bf16.gmra.mrb[60].mxu0 %v3565_v11  ;;  %927 = vmatmul.mubr.bf16.gmra.mrb[60].mxu1 %v3565_v11 }
  0x9e   :  { %2139 = vmatprep.mubr.bf16.mxu1 %v3686_v8  ;;  %3500 = vmatprep.mubr.bf16.mxu0 %v3566_v54 }
  0xf8   :  { %v519_v5 = vpop.f32.mrb[0].mxu0  ;;  %v632_v13 = vpop.f32.mrb[0].mxu1 }
  0xf9   :  { %v521_v12 = vpop.f32.mrb[1].mxu0  ;;  %v1034_v14 = vrot.slane %v632_v13, 2  ;;  %v634_v16 = vpop.f32.mrb[1].mxu1 }
  0xfa   :  { %v523_v15 = vpop.f32.mrb[2].mxu0  ;;  %v1114_v17 = vrot.slane %v634_v16, 3  ;;  %v636_v19 = vpop.f32.mrb[2].mxu1  ;;  %v954_v20 = vrot.slane %v521_v12, 1 }
  0xfb   :  { %v525_v18 = vpop.f32.mrb[3].mxu0  ;;  %v1035_v22 = vrot.slane %v636_v19, 2  ;;  %v638_v23 = vpop.f32.mrb[3].mxu1 }
  0xfc   :  { %v955_v21 = vrot.slane %v525_v18, 1  ;;  %v1115_v24 = vrot.slane %v638_v23, 3 }
  0xfd   :  { %v1036_v26 = vsel %vm1033_vm1, %v1034_v14, %v1035_v22 }
  0xfe   :  { %v956_v25 = vsel %vm953_vm0, %v954_v20, %v955_v21  ;;  %v1116_v28 = vsel %vm1113_vm2, %v1114_v17, %v1115_v24 }
  0xff   :  { %v1001_v27 = vadd.f32 %v956_v25, %v519_v5 }
 0x100   :  { %v529_v29 = vpop.f32.mrb[4].mxu0  ;;  %v642_v31 = vpop.f32.mrb[4].mxu1 }
 0x101   :  { %v1081_v30 = vadd.f32 %v1036_v26, %v1001_v27  ;;  %v531_v32 = vpop.f32.mrb[5].mxu0  ;;  %v1037_v33 = vrot.slane %v642_v31, 2  ;;  %v644_v35 = vpop.f32.mrb[5].mxu1 }
 0x102   :  { %v957_v34 = vrot.slane %v531_v32, 1  ;;  %v533_v36 = vpop.f32.mrb[6].mxu0  ;;  %v1117_v38 = vrot.slane %v644_v35, 3  ;;  %v646_v40 = vpop.f32.mrb[6].mxu1 }
 0x103   :  { %v4019_v37 = vadd.f32 %v1116_v28, %v1081_v30  ;;  %v535_v39 = vpop.f32.mrb[7].mxu0  ;;  %v1038_v41 = vsel %vm1033_vm1, %v1035_v22, %v1037_v33  ;;  %v1039_v44 = vrot.slane %v646_v40, 2  ;;  %v648_v45 = vpop.f32.mrb[7].mxu1 }
 0x104   :  { %v958_v42 = vsel %vm953_vm0, %v955_v21, %v957_v34  ;;  %v959_v43 = vrot.slane %v535_v39, 1  ;;  %v1118_v47 = vsel %vm1113_vm2, %v1115_v24, %v1117_v38  ;;  %v1119_v48 = vrot.slane %v648_v45, 3 }
 0x105   :  { %v1002_v46 = vadd.f32 %v958_v42, %v523_v15  ;;  %v1040_v50 = vsel %vm1033_vm1, %v1037_v33, %v1039_v44 }
 0x106   :  { %v960_v49 = vsel %vm953_vm0, %v957_v34, %v959_v43  ;;  %v1120_v53 = vsel %vm1113_vm2, %v1117_v38, %v1119_v48 }
 0x107   :  { %v1082_v51 = vadd.f32 %v1038_v41, %v1002_v46  ;;  %v1003_v52 = vadd.f32 %v960_v49, %v529_v29 }
 0x108   :  { %v539_v55 = vpop.f32.mrb[8].mxu0  ;;  %v652_v58 = vpop.f32.mrb[8].mxu1 }
 0x109   :  { %v4030_v56 = vadd.f32 %v1118_v47, %v1082_v51  ;;  %v1083_v57 = vadd.f32 %v1040_v50, %v1003_v52  ;;  %v541_v59 = vpop.f32.mrb[9].mxu0  ;;  %v1041_v60 = vrot.slane %v652_v58, 2  ;;  %v654_v62 = vpop.f32.mrb[9].mxu1 }
 0x10a   :  { %v961_v61 = vrot.slane %v541_v59, 1  ;;  %v543_v63 = vpop.f32.mrb[10].mxu0  ;;  %v1121_v1 = vrot.slane %v654_v62, 3  ;;  %v656_v3 = vpop.f32.mrb[10].mxu1 }
 0x10b   :  { %v4032_v0 = vadd.f32 %v1120_v53, %v1083_v57  ;;  %v545_v2 = vpop.f32.mrb[11].mxu0  ;;  %v1042_v4 = vsel %vm1033_vm1, %v1039_v44, %v1041_v60  ;;  %v1043_v9 = vrot.slane %v656_v3, 2  ;;  %v658_v10 = vpop.f32.mrb[11].mxu1 }
 0x10c   :  { %v962_v6 = vsel %vm953_vm0, %v959_v43, %v961_v61  ;;  %v963_v7 = vrot.slane %v545_v2, 1  ;;  %v1122_v5 = vsel %vm1113_vm2, %v1119_v48, %v1121_v1  ;;  %v1123_v12 = vrot.slane %v658_v10, 3 }
 0x10d   :  { %v1004_v11 = vadd.f32 %v962_v6, %v533_v36  ;;  %v1044_v14 = vsel %vm1033_vm1, %v1041_v60, %v1043_v9 }
 0x10e   :  { %v964_v13 = vsel %vm953_vm0, %v961_v61, %v963_v7  ;;  %v1124_v17 = vsel %vm1113_vm2, %v1121_v1, %v1123_v12 }
 0x10f   :  { %v1084_v15 = vadd.f32 %v1042_v4, %v1004_v11  ;;  %v1005_v16 = vadd.f32 %v964_v13, %v539_v55 }
 0x110   :  { %v549_v18 = vpop.f32.mrb[12].mxu0  ;;  %v662_v21 = vpop.f32.mrb[12].mxu1 }
 0x111   :  { %v4040_v19 = vadd.f32 %v1122_v5, %v1084_v15  ;;  %v1085_v20 = vadd.f32 %v1044_v14, %v1005_v16  ;;  %v551_v22 = vpop.f32.mrb[13].mxu0  ;;  %v1045_v23 = vrot.slane %v662_v21, 2  ;;  %v664_v25 = vpop.f32.mrb[13].mxu1  ;;  %v1727_v21 = vld [vmem:[%s4683_s4 + $0x20] sm:$0xff] }
 0x112   :  { %v965_v24 = vrot.slane %v551_v22, 1  ;;  %v553_v26 = vpop.f32.mrb[14].mxu0  ;;  %v1125_v28 = vrot.slane %v664_v25, 3  ;;  %v666_v30 = vpop.f32.mrb[14].mxu1 }
 0x113   :  { %v4042_v27 = vadd.f32 %v1124_v17, %v1085_v20  ;;  %v555_v29 = vpop.f32.mrb[15].mxu0  ;;  %v1046_v31 = vsel %vm1033_vm1, %v1043_v9, %v1045_v23  ;;  %v1047_v34 = vrot.slane %v666_v30, 2  ;;  %v668_v35 = vpop.f32.mrb[15].mxu1  ;;  %v1723_v20 = vld [vmem:[%s4683_s4] sm:$0xff] }
 0x114   :  { %v966_v32 = vsel %vm953_vm0, %v963_v7, %v965_v24  ;;  %v967_v33 = vrot.slane %v555_v29, 1  ;;  %v1126_v38 = vsel %vm1113_vm2, %v1123_v12, %v1125_v28  ;;  %v1127_v39 = vrot.slane %v668_v35, 3  ;;  %v1731_v29 = vld [vmem:[%s4683_s4 + $0x40] sm:$0xff] }
 0x115   :  { %v1006_v36 = vadd.f32 %v966_v32, %v543_v63  ;;  %v1048_v41 = vsel %vm1033_vm1, %v1045_v23, %v1047_v34  ;;  %v1735_v30 = vld [vmem:[%s4683_s4 + $0x60] sm:$0xff] }
 0x116   :  { %v968_v40 = vsel %vm953_vm0, %v965_v24, %v967_v33  ;;  %v1128_v44 = vsel %vm1113_vm2, %v1125_v28, %v1127_v39  ;;  %v3318_v28 = vcombine.high %v1723_v20, %v1727_v21 }
 0x117   :  { %v1086_v42 = vadd.f32 %v1046_v31, %v1006_v36  ;;  %v1007_v43 = vadd.f32 %v968_v40, %v549_v18  ;;  %v1739_v36 = vld [vmem:[%s4683_s4 + $0x80] sm:$0xff] }
 0x118   :  { %v559_v45 = vpop.f32.mrb[16].mxu0  ;;  %v672_v48 = vpop.f32.mrb[16].mxu1  ;;  %2107 = vmatprep.subr.bf16.mxu1 %v3318_v28 }
 0x119   :  { %v4050_v46 = vadd.f32 %v1126_v38, %v1086_v42  ;;  %v1087_v47 = vadd.f32 %v1048_v41, %v1007_v43  ;;  %v561_v49 = vpop.f32.mrb[17].mxu0  ;;  %v1049_v50 = vrot.slane %v672_v48, 2  ;;  %v674_v52 = vpop.f32.mrb[17].mxu1  ;;  %v1743_v38 = vld [vmem:[%s4683_s4 + $0xa0] sm:$0xff] }
 0x11a   :  { %v969_v51 = vrot.slane %v561_v49, 1  ;;  %v563_v53 = vpop.f32.mrb[18].mxu0  ;;  %v1129_v55 = vrot.slane %v674_v52, 3  ;;  %v676_v58 = vpop.f32.mrb[18].mxu1  ;;  %v1747_v52 = vld [vmem:[%s4683_s4 + $0xc0] sm:$0xff] }
 0x11b   :  { %v4052_v54 = vadd.f32 %v1128_v44, %v1087_v47  ;;  %v565_v57 = vpop.f32.mrb[19].mxu0  ;;  %v1050_v59 = vsel %vm1033_vm1, %v1047_v34, %v1049_v50  ;;  %v1051_v62 = vrot.slane %v676_v58, 2  ;;  %v678_v63 = vpop.f32.mrb[19].mxu1  ;;  %v3325_v44 = vcombine.low %v1731_v29, %v1735_v30 }
 0x11c   :  { %v970_v60 = vsel %vm953_vm0, %v967_v33, %v969_v51  ;;  %v971_v61 = vrot.slane %v565_v57, 1  ;;  %v1130_v2 = vsel %vm1113_vm2, %v1127_v39, %v1129_v55  ;;  %v1131_v3 = vrot.slane %v678_v63, 3 }
 0x11d   :  { %v1008_v1 = vadd.f32 %v970_v60, %v553_v26  ;;  %v1052_v6 = vsel %vm1033_vm1, %v1049_v50, %v1051_v62  ;;  %v3317_v26 = vcombine.low %v1723_v20, %v1727_v21  ;;  %v3334_v50 = vcombine.high %v1739_v36, %v1743_v38 }
 0x11e   :  { %v972_v4 = vsel %vm953_vm0, %v969_v51, %v971_v61  ;;  %v1132_v10 = vsel %vm1113_vm2, %v1129_v55, %v1131_v3 }
 0x11f   :  { %v1088_v7 = vadd.f32 %v1050_v59, %v1008_v1  ;;  %v1009_v9 = vadd.f32 %v972_v4, %v559_v45  ;;  %2108 = vmatpush1.bf16.msra.mxu1 %v3317_v26  ;;  %v3326_v45 = vcombine.high %v1731_v29, %v1735_v30  ;;  %v3333_v1 = vcombine.low %v1739_v36, %v1743_v38 }
 0x120   :  { %v569_v11 = vpop.f32.mrb[20].mxu0  ;;  %v682_v13 = vpop.f32.mrb[20].mxu1 }
 0x121   :  { %v4060_v5 = vadd.f32 %v1130_v2, %v1088_v7  ;;  %v1089_v12 = vadd.f32 %v1052_v6, %v1009_v9  ;;  %v571_v14 = vpop.f32.mrb[21].mxu0  ;;  %v1053_v15 = vrot.slane %v682_v13, 2  ;;  %v684_v17 = vpop.f32.mrb[21].mxu1  ;;  %2109 = vmatprep.subr.bf16.mxu1 %v3326_v45 }
 0x122   :  { %v973_v16 = vrot.slane %v571_v14, 1  ;;  %v573_v18 = vpop.f32.mrb[22].mxu0  ;;  %v1133_v23 = vrot.slane %v684_v17, 3  ;;  %v686_v25 = vpop.f32.mrb[22].mxu1 }
 0x123   :  { %v4068_v22 = vadd.f32 %v1132_v10, %v1089_v12  ;;  %v575_v24 = vpop.f32.mrb[23].mxu0  ;;  %v1054_v31 = vsel %vm1033_vm1, %v1051_v62, %v1053_v15  ;;  %v1055_v34 = vrot.slane %v686_v25, 2  ;;  %v688_v35 = vpop.f32.mrb[23].mxu1  ;;  %2110 = vmatpush1.bf16.msra.mxu1 %v3325_v44 }
 0x124   :  { %v974_v32 = vsel %vm953_vm0, %v971_v61, %v973_v16  ;;  %v975_v33 = vrot.slane %v575_v24, 1  ;;  %v1134_v40 = vsel %vm1113_vm2, %v1131_v3, %v1133_v23  ;;  %v1135_v41 = vrot.slane %v688_v35, 3  ;;  %2111 = vmatprep.subr.bf16.mxu1 %v3334_v50 }
 0x125   :  { %v1010_v39 = vadd.f32 %v974_v32, %v563_v53  ;;  %v1056_v43 = vsel %vm1033_vm1, %v1053_v15, %v1055_v34  ;;  %v1751_v53 = vld [vmem:[%s4683_s4 + $0xe0] sm:$0xff] }
 0x126   :  { %v976_v42 = vsel %vm953_vm0, %v973_v16, %v975_v33  ;;  %v1136_v49 = vsel %vm1113_vm2, %v1133_v23, %v1135_v41  ;;  %v3342_v7 = vcombine.high %v1747_v52, %v1751_v53  ;;  %v3341_v21 = vcombine.low %v1747_v52, %v1751_v53 }
 0x127   :  { %v1090_v47 = vadd.f32 %v1054_v31, %v1010_v39  ;;  %v1011_v48 = vadd.f32 %v976_v42, %v569_v11  ;;  %2112 = vmatpush1.bf16.msra.mxu1 %v3333_v1 }
 0x128   :  { %v579_v51 = vpop.f32.mrb[24].mxu0  ;;  %v692_v58 = vpop.f32.mrb[24].mxu1  ;;  %2113 = vmatprep.subr.bf16.mxu1 %v3342_v7 }
 0x129   :  { %v4094_v55 = vadd.f32 %v1134_v40, %v1090_v47  ;;  %v1091_v57 = vadd.f32 %v1056_v43, %v1011_v48  ;;  %v581_v59 = vpop.f32.mrb[25].mxu0  ;;  %v1057_v60 = vrot.slane %v692_v58, 2  ;;  %v694_v62 = vpop.f32.mrb[25].mxu1 }
 0x12a   :  { %v977_v61 = vrot.slane %v581_v59, 1  ;;  %v583_v63 = vpop.f32.mrb[26].mxu0  ;;  %v1137_v3 = vrot.slane %v694_v62, 3  ;;  %v696_v6 = vpop.f32.mrb[26].mxu1 }
 0x12b   :  { %v4096_v2 = vadd.f32 %v1136_v49, %v1091_v57  ;;  %v585_v4 = vpop.f32.mrb[27].mxu0  ;;  %v1058_v9 = vsel %vm1033_vm1, %v1055_v34, %v1057_v60  ;;  %v1059_v12 = vrot.slane %v696_v6, 2  ;;  %v698_v13 = vpop.f32.mrb[27].mxu1  ;;  %2114 = vmatpush1.bf16.msra.mxu1 %v3341_v21 }
 0x12c   :  { %v978_v10 = vsel %vm953_vm0, %v975_v33, %v977_v61  ;;  %v979_v11 = vrot.slane %v585_v4, 1  ;;  %v1138_v15 = vsel %vm1113_vm2, %v1135_v41, %v1137_v3  ;;  %v1139_v16 = vrot.slane %v698_v13, 3 }
 0x12d   :  { %v1012_v14 = vadd.f32 %v978_v10, %v573_v18  ;;  %v1060_v20 = vsel %vm1033_vm1, %v1057_v60, %v1059_v12 }
 0x12e   :  { %v980_v17 = vsel %vm953_vm0, %v977_v61, %v979_v11  ;;  %v1140_v25 = vsel %vm1113_vm2, %v1137_v3, %v1139_v16 }
 0x12f   :  { %v1092_v23 = vadd.f32 %v1058_v9, %v1012_v14  ;;  %v1013_v24 = vadd.f32 %v980_v17, %v579_v51 }
 0x130   :  { %v589_v26 = vpop.f32.mrb[28].mxu0  ;;  %v702_v30 = vpop.f32.mrb[28].mxu1 }
 0x131   :  { %v4104_v28 = vadd.f32 %v1138_v15, %v1092_v23  ;;  %v1093_v29 = vadd.f32 %v1060_v20, %v1013_v24  ;;  %v591_v18 = vpop.f32.mrb[29].mxu0  ;;  %v1061_v31 = vrot.slane %v702_v30, 2  ;;  %v704_v33 = vpop.f32.mrb[29].mxu1 }
 0x132   :  { %v981_v32 = vrot.slane %v591_v18, 1  ;;  %v593_v34 = vpop.f32.mrb[30].mxu0  ;;  %v1141_v36 = vrot.slane %v704_v33, 3  ;;  %v706_v39 = vpop.f32.mrb[30].mxu1 }
 0x133   :  { %v4106_v35 = vadd.f32 %v1140_v25, %v1093_v29  ;;  %v595_v38 = vpop.f32.mrb[31].mxu0  ;;  %v1062_v40 = vsel %vm1033_vm1, %v1059_v12, %v1061_v31  ;;  %v1063_v43 = vrot.slane %v706_v39, 2  ;;  %v708_v44 = vpop.f32.mrb[31].mxu1 }
 0x134   :  { %v982_v41 = vsel %vm953_vm0, %v979_v11, %v981_v32  ;;  %v983_v42 = vrot.slane %v595_v38, 1  ;;  %v1142_v47 = vsel %vm1113_vm2, %v1139_v16, %v1141_v36  ;;  %v1143_v48 = vrot.slane %v708_v44, 3 }
 0x135   :  { %v1014_v45 = vadd.f32 %v982_v41, %v583_v63  ;;  %v1064_v51 = vsel %vm1033_vm1, %v1061_v31, %v1063_v43 }
 0x136   :  { %v984_v49 = vsel %vm953_vm0, %v981_v32, %v983_v42  ;;  %v1016_v50 = vadd.f32 %v983_v42, %v593_v34  ;;  %v1144_v57 = vsel %vm1113_vm2, %v1141_v36, %v1143_v48 }
 0x137   :  { %v1094_v52 = vadd.f32 %v1062_v40, %v1014_v45  ;;  %v1015_v53 = vadd.f32 %v984_v49, %v589_v26 }
 0x138   :  { %v1096_v58 = vadd.f32 %v1063_v43, %v1016_v50  ;;  %v745_v59 = vpop.f32.mrb[32].mxu0  ;;  %v858_v1 = vpop.f32.mrb[32].mxu1 }
 0x139   :  { %v4114_v60 = vadd.f32 %v1142_v47, %v1094_v52  ;;  %v1095_v61 = vadd.f32 %v1064_v51, %v1015_v53  ;;  %v747_v62 = vpop.f32.mrb[33].mxu0  ;;  %v1354_v3 = vrot.slane %v858_v1, 6  ;;  %v860_v6 = vpop.f32.mrb[33].mxu1  ;;  %v1194_v9 = vrot.slane %v745_v59, 4 }
 0x13a   :  { %v4116_v63 = vadd.f32 %v1143_v48, %v1096_v58  ;;  %v749_v4 = vpop.f32.mrb[34].mxu0  ;;  %v1434_v11 = vrot.slane %v860_v6, 7  ;;  %v862_v13 = vpop.f32.mrb[34].mxu1  ;;  %v1274_v14 = vrot.slane %v747_v62, 5  ;;  %v4138_v6 = vld [vmem:[%s4681_s2] ss:$0 sm:$0xff] }
 0x13b   :  { %v4118_v7 = vadd.f32 %v1144_v57, %v1095_v61  ;;  %v1195_v10 = vrot.slane %v749_v4, 4  ;;  %v751_v12 = vpop.f32.mrb[35].mxu0  ;;  %v1355_v16 = vrot.slane %v862_v13, 6  ;;  %v864_v17 = vpop.f32.mrb[35].mxu1 }
 0x13c   :  { %v1275_v15 = vrot.slane %v751_v12, 5  ;;  %v1435_v21 = vrot.slane %v864_v17, 7 }
 0x13d   :  { %v1196_v20 = vsel %vm1193_vm3, %v1194_v9, %v1195_v10  ;;  %v1356_v25 = vsel %vm1353_vm5, %v1354_v3, %v1355_v16 }
 0x13e   :  { %v1241_v23 = vadd.f32 %v1196_v20, %v4019_v37  ;;  %v1276_v24 = vsel %vm1273_vm4, %v1274_v14, %v1275_v15  ;;  %v1436_v26 = vsel %vm1433_vm6, %v1434_v11, %v1435_v21 }
 0x140   :  { %v1321_v29 = vadd.f32 %v1276_v24, %v1241_v23  ;;  %v755_v30 = vpop.f32.mrb[36].mxu0  ;;  %v868_v31 = vpop.f32.mrb[36].mxu1 }
 0x141   :  { %v1197_v18 = vrot.slane %v755_v30, 4  ;;  %v757_v32 = vpop.f32.mrb[37].mxu0  ;;  %v1357_v34 = vrot.slane %v868_v31, 6  ;;  %v870_v38 = vpop.f32.mrb[37].mxu1 }
 0x142   :  { %v1401_v33 = vadd.f32 %v1356_v25, %v1321_v29  ;;  %v1277_v36 = vrot.slane %v757_v32, 5  ;;  %v759_v39 = vpop.f32.mrb[38].mxu0  ;;  %v1437_v41 = vrot.slane %v870_v38, 7  ;;  %v872_v43 = vpop.f32.mrb[38].mxu1 }
 0x143   :  { %v1198_v40 = vsel %vm1193_vm3, %v1195_v10, %v1197_v18  ;;  %v1199_v37 = vrot.slane %v759_v39, 4  ;;  %v761_v42 = vpop.f32.mrb[39].mxu0  ;;  %v1358_v47 = vsel %vm1353_vm5, %v1355_v16, %v1357_v34  ;;  %v874_v49 = vpop.f32.mrb[39].mxu1  ;;  %v1359_v53 = vrot.slane %v872_v43, 6 }
 0x144   :  { %v1481_v44 = vadd.f32 %v1436_v26, %v1401_v33  ;;  %v1242_v45 = vadd.f32 %v1198_v40, %v4030_v56  ;;  %v1278_v48 = vsel %vm1273_vm4, %v1275_v15, %v1277_v36  ;;  %v1438_v50 = vsel %vm1433_vm6, %v1435_v21, %v1437_v41 }
 0x145   :  { %v1200_v51 = vsel %vm1193_vm3, %v1197_v18, %v1199_v37  ;;  %v1279_v52 = vrot.slane %v761_v42, 5  ;;  %v1439_v59 = vrot.slane %v874_v49, 7  ;;  %v1360_v62 = vsel %vm1353_vm5, %v1357_v34, %v1359_v53 }
 0x146   :  { %v1322_v57 = vadd.f32 %v1278_v48, %v1242_v45  ;;  %v1243_v58 = vadd.f32 %v1200_v51, %v4032_v0  ;;  %v1504_v25 = vadd.f32 %v4138_v6, %v1481_v44 }
 0x147   :  { %v1280_v61 = vsel %vm1273_vm4, %v1277_v36, %v1279_v52  ;;  %v1440_v3 = vsel %vm1433_vm6, %v1437_v41, %v1439_v59 }
 0x148   :  { %v1402_v56 = vadd.f32 %v1358_v47, %v1322_v57  ;;  %v1323_v1 = vadd.f32 %v1280_v61, %v1243_v58  ;;  %v765_v4 = vpop.f32.mrb[40].mxu0  ;;  %v878_v10 = vpop.f32.mrb[40].mxu1  ;;  %v1520_v51 = vmax.f32 %v1504_v25, 0.0 }
 0x149   :  { %v1201_v9 = vrot.slane %v765_v4, 4  ;;  %v767_v11 = vpop.f32.mrb[41].mxu0  ;;  %v1361_v13 = vrot.slane %v878_v10, 6  ;;  %v880_v15 = vpop.f32.mrb[41].mxu1 }
 0x14a   :  { %v1482_v12 = vadd.f32 %v1438_v50, %v1402_v56  ;;  %v1403_v0 = vadd.f32 %v1360_v62, %v1323_v1  ;;  %v1281_v14 = vrot.slane %v767_v11, 5  ;;  %v769_v16 = vpop.f32.mrb[42].mxu0  ;;  %v1441_v20 = vrot.slane %v880_v15, 7  ;;  %v882_v24 = vpop.f32.mrb[42].mxu1 }
 0x14b   :  { %v1202_v17 = vsel %vm1193_vm3, %v1199_v37, %v1201_v9  ;;  %v1203_v21 = vrot.slane %v769_v16, 4  ;;  %v771_v23 = vpop.f32.mrb[43].mxu0  ;;  %v1362_v30 = vsel %vm1353_vm5, %v1359_v53, %v1361_v13  ;;  %v884_v31 = vpop.f32.mrb[43].mxu1  ;;  %v1363_v36 = vrot.slane %v882_v24, 6 }
 0x14c   :  { %v1483_v26 = vadd.f32 %v1440_v3, %v1403_v0  ;;  %v1244_v29 = vadd.f32 %v1202_v17, %v4040_v19  ;;  %v1282_v18 = vsel %vm1273_vm4, %v1279_v52, %v1281_v14  ;;  %v1442_v32 = vsel %vm1433_vm6, %v1439_v59, %v1441_v20 }
 0x14d   :  { %v1204_v33 = vsel %vm1193_vm3, %v1201_v9, %v1203_v21  ;;  %v1283_v34 = vrot.slane %v771_v23, 5  ;;  %v1443_v40 = vrot.slane %v884_v31, 7  ;;  %v1505_v41 = vadd.f32 %v4138_v6, %v1482_v12 }
 0x14e   :  { %v1324_v38 = vadd.f32 %v1282_v18, %v1244_v29  ;;  %v1245_v39 = vadd.f32 %v1204_v33, %v4042_v27  ;;  %v1364_v19 = vsel %vm1353_vm5, %v1361_v13, %v1363_v36  ;;  %v1506_v52 = vadd.f32 %v4138_v6, %v1483_v26 }
 0x14f   :  { %v1284_v37 = vsel %vm1273_vm4, %v1281_v14, %v1283_v34  ;;  %v1444_v44 = vsel %vm1433_vm6, %v1441_v20, %v1443_v40  ;;  %v1521_v47 = vmax.f32 %v1505_v41, 0.0 }
 0x150   :  { %v1404_v42 = vadd.f32 %v1362_v30, %v1324_v38  ;;  %v1325_v43 = vadd.f32 %v1284_v37, %v1245_v39  ;;  %v775_v45 = vpop.f32.mrb[44].mxu0  ;;  %v888_v49 = vpop.f32.mrb[44].mxu1 }
 0x151   :  { %v1205_v48 = vrot.slane %v775_v45, 4  ;;  %v777_v50 = vpop.f32.mrb[45].mxu0  ;;  %v1365_v57 = vrot.slane %v888_v49, 6  ;;  %v890_v59 = vpop.f32.mrb[45].mxu1  ;;  %v1536_v3 = vpack.c.bf16 %v1521_v47, %v1520_v51 }
 0x152   :  { %v1484_v27 = vadd.f32 %v1442_v32, %v1404_v42  ;;  %v1405_v53 = vadd.f32 %v1364_v19, %v1325_v43  ;;  %v1285_v58 = vrot.slane %v777_v50, 5  ;;  %v779_v61 = vpop.f32.mrb[46].mxu0  ;;  %v1445_v56 = vrot.slane %v890_v59, 7  ;;  %v892_v9 = vpop.f32.mrb[46].mxu1 }
 0x153   :  { %v1206_v62 = vsel %vm1193_vm3, %v1203_v21, %v1205_v48  ;;  %v1207_v1 = vrot.slane %v779_v61, 4  ;;  %v781_v4 = vpop.f32.mrb[47].mxu0  ;;  %v1366_v12 = vsel %vm1353_vm5, %v1363_v36, %v1365_v57  ;;  %v894_v13 = vpop.f32.mrb[47].mxu1  ;;  %3484 = vmatprep.subr.bf16.mxu0 %v1536_v3  ;;  %v1367_v17 = vrot.slane %v892_v9, 6 }
 0x154   :  { %v1485_v10 = vadd.f32 %v1444_v44, %v1405_v53  ;;  %v1246_v11 = vadd.f32 %v1206_v62, %v4050_v46  ;;  %v1286_v0 = vsel %vm1273_vm4, %v1283_v34, %v1285_v58  ;;  %v1446_v14 = vsel %vm1433_vm6, %v1443_v40, %v1445_v56  ;;  %3485 = vmatpush3.bf16.msra.mxu0 %v1536_v3 }
 0x155   :  { %v1208_v15 = vsel %vm1193_vm3, %v1205_v48, %v1207_v1  ;;  %v1287_v16 = vrot.slane %v781_v4, 5  ;;  %v1447_v23 = vrot.slane %v894_v13, 7  ;;  %v1507_v24 = vadd.f32 %v4138_v6, %v1484_v27 }
 0x156   :  { %v1326_v20 = vadd.f32 %v1286_v0, %v1246_v11  ;;  %v1247_v21 = vadd.f32 %v1208_v15, %v4052_v54  ;;  %v1368_v25 = vsel %vm1353_vm5, %v1365_v57, %v1367_v17  ;;  %v1522_v36 = vmax.f32 %v1506_v52, 0.0 }
 0x157   :  { %v1288_v46 = vsel %vm1273_vm4, %v1285_v58, %v1287_v16  ;;  %v1448_v30 = vsel %vm1433_vm6, %v1445_v56, %v1447_v23  ;;  %v1523_v31 = vmax.f32 %v1507_v24, 0.0  ;;  %v1508_v54 = vadd.f32 %v4138_v6, %v1485_v10 }
 0x158   :  { %v1406_v26 = vadd.f32 %v1366_v12, %v1326_v20  ;;  %v1327_v29 = vadd.f32 %v1288_v46, %v1247_v21  ;;  %v785_v18 = vpop.f32.mrb[48].mxu0  ;;  %v898_v33 = vpop.f32.mrb[48].mxu1 }
 0x159   :  { %v1209_v32 = vrot.slane %v785_v18, 4  ;;  %v787_v34 = vpop.f32.mrb[49].mxu0  ;;  %v1369_v40 = vrot.slane %v898_v33, 6  ;;  %v900_v37 = vpop.f32.mrb[49].mxu1  ;;  %v1537_v45 = vpack.c.bf16 %v1523_v31, %v1522_v36  ;;  %v1524_v15 = vmax.f32 %v1508_v54, 0.0 }
 0x15a   :  { %v1486_v38 = vadd.f32 %v1446_v14, %v1406_v26  ;;  %v1407_v39 = vadd.f32 %v1368_v25, %v1327_v29  ;;  %v1289_v41 = vrot.slane %v787_v34, 5  ;;  %v789_v19 = vpop.f32.mrb[50].mxu0  ;;  %v1449_v43 = vrot.slane %v900_v37, 7  ;;  %v902_v48 = vpop.f32.mrb[50].mxu1 }
 0x15b   :  { %v1210_v42 = vsel %vm1193_vm3, %v1207_v1, %v1209_v32  ;;  %v1211_v44 = vrot.slane %v789_v19, 4  ;;  %v791_v47 = vpop.f32.mrb[51].mxu0  ;;  %v1370_v51 = vsel %vm1353_vm5, %v1367_v17, %v1369_v40  ;;  %v904_v27 = vpop.f32.mrb[51].mxu1  ;;  %3486 = vmatprep.subr.bf16.mxu0 %v1537_v45  ;;  %v1371_v59 = vrot.slane %v902_v48, 6 }
 0x15c   :  { %v1487_v49 = vadd.f32 %v1448_v30, %v1407_v39  ;;  %v1248_v50 = vadd.f32 %v1210_v42, %v4060_v5  ;;  %v1290_v52 = vsel %vm1273_vm4, %v1287_v16, %v1289_v41  ;;  %v1450_v53 = vsel %vm1433_vm6, %v1447_v23, %v1449_v43  ;;  %3487 = vmatpush3.bf16.msra.mxu0 %v1537_v45 }
 0x15d   :  { %v1212_v57 = vsel %vm1193_vm3, %v1209_v32, %v1211_v44  ;;  %v1291_v58 = vrot.slane %v791_v47, 5  ;;  %v1451_v56 = vrot.slane %v904_v27, 7  ;;  %v1509_v1 = vadd.f32 %v4138_v6, %v1486_v38 }
 0x15e   :  { %v1328_v61 = vadd.f32 %v1290_v52, %v1248_v50  ;;  %v1249_v62 = vadd.f32 %v1212_v57, %v4068_v22  ;;  %v1372_v3 = vsel %vm1353_vm5, %v1369_v40, %v1371_v59  ;;  %v1510_v22 = vadd.f32 %v4138_v6, %v1487_v49 }
 0x15f   :  { %v1292_v5 = vsel %vm1273_vm4, %v1289_v41, %v1291_v58  ;;  %v1452_v10 = vsel %vm1433_vm6, %v1449_v43, %v1451_v56  ;;  %v1525_v12 = vmax.f32 %v1509_v1, 0.0 }
 0x160   :  { %v1408_v4 = vadd.f32 %v1370_v51, %v1328_v61  ;;  %v1329_v9 = vadd.f32 %v1292_v5, %v1249_v62  ;;  %v795_v11 = vpop.f32.mrb[52].mxu0  ;;  %v908_v13 = vpop.f32.mrb[52].mxu1  ;;  %v1526_v27 = vmax.f32 %v1510_v22, 0.0 }
 0x161   :  { %v1213_v0 = vrot.slane %v795_v11, 4  ;;  %v797_v14 = vpop.f32.mrb[53].mxu0  ;;  %v1373_v20 = vrot.slane %v908_v13, 6  ;;  %v910_v23 = vpop.f32.mrb[53].mxu1  ;;  %v1538_v29 = vpack.c.bf16 %v1525_v12, %v1524_v15 }
 0x162   :  { %v1488_v16 = vadd.f32 %v1450_v53, %v1408_v4  ;;  %v1409_v17 = vadd.f32 %v1372_v3, %v1329_v9  ;;  %v1293_v21 = vrot.slane %v797_v14, 5  ;;  %v799_v24 = vpop.f32.mrb[54].mxu0  ;;  %v1453_v25 = vrot.slane %v910_v23, 7  ;;  %v912_v18 = vpop.f32.mrb[54].mxu1 }
 0x163   :  { %v1214_v46 = vsel %vm1193_vm3, %v1211_v44, %v1213_v0  ;;  %v1215_v26 = vrot.slane %v799_v24, 4  ;;  %v801_v30 = vpop.f32.mrb[55].mxu0  ;;  %v1374_v33 = vsel %vm1353_vm5, %v1371_v59, %v1373_v20  ;;  %v914_v36 = vpop.f32.mrb[55].mxu1  ;;  %3488 = vmatprep.subr.bf16.mxu0 %v1538_v29  ;;  %v1375_v40 = vrot.slane %v912_v18, 6 }
 0x164   :  { %v1489_v31 = vadd.f32 %v1452_v10, %v1409_v17  ;;  %v1250_v32 = vadd.f32 %v1214_v46, %v4094_v55  ;;  %v1294_v34 = vsel %vm1273_vm4, %v1291_v58, %v1293_v21  ;;  %v1454_v54 = vsel %vm1433_vm6, %v1451_v56, %v1453_v25  ;;  %3489 = vmatpush3.bf16.msra.mxu0 %v1538_v29 }
 0x165   :  { %v1216_v38 = vsel %vm1193_vm3, %v1213_v0, %v1215_v26  ;;  %v1295_v39 = vrot.slane %v801_v30, 5  ;;  %v1455_v19 = vrot.slane %v914_v36, 7  ;;  %v1511_v42 = vadd.f32 %v4138_v6, %v1488_v16 }
 0x166   :  { %v1330_v41 = vadd.f32 %v1294_v34, %v1250_v32  ;;  %v1251_v37 = vadd.f32 %v1216_v38, %v4096_v2  ;;  %v1376_v43 = vsel %vm1353_vm5, %v1373_v20, %v1375_v40  ;;  %v1512_v2 = vadd.f32 %v4138_v6, %v1489_v31 }
 0x167   :  { %v1296_v55 = vsel %vm1273_vm4, %v1293_v21, %v1295_v39  ;;  %v1456_v47 = vsel %vm1433_vm6, %v1453_v25, %v1455_v19  ;;  %v1527_v49 = vmax.f32 %v1511_v42, 0.0 }
 0x168   :  { %v1410_v44 = vadd.f32 %v1374_v33, %v1330_v41  ;;  %v1331_v45 = vadd.f32 %v1296_v55, %v1251_v37  ;;  %v805_v48 = vpop.f32.mrb[56].mxu0  ;;  %v918_v51 = vpop.f32.mrb[56].mxu1  ;;  %v1528_v33 = vmax.f32 %v1512_v2, 0.0 }
 0x169   :  { %v1217_v50 = vrot.slane %v805_v48, 4  ;;  %v807_v52 = vpop.f32.mrb[57].mxu0  ;;  %v1377_v58 = vrot.slane %v918_v51, 6  ;;  %v920_v61 = vpop.f32.mrb[57].mxu1  ;;  %v1539_v3 = vpack.c.bf16 %v1527_v49, %v1526_v27 }
 0x16a   :  { %v1490_v53 = vadd.f32 %v1454_v54, %v1410_v44  ;;  %v1411_v57 = vadd.f32 %v1376_v43, %v1331_v45  ;;  %v1297_v59 = vrot.slane %v807_v52, 5  ;;  %v809_v62 = vpop.f32.mrb[58].mxu0  ;;  %v1457_v1 = vrot.slane %v920_v61, 7  ;;  %v922_v9 = vpop.f32.mrb[58].mxu1 }
 0x16b   :  { %v1218_v56 = vsel %vm1193_vm3, %v1215_v26, %v1217_v50  ;;  %v1219_v5 = vrot.slane %v809_v62, 4  ;;  %v811_v4 = vpop.f32.mrb[59].mxu0  ;;  %v1378_v12 = vsel %vm1353_vm5, %v1375_v40, %v1377_v58  ;;  %v924_v13 = vpop.f32.mrb[59].mxu1  ;;  %3490 = vmatprep.subr.bf16.mxu0 %v1539_v3  ;;  %v1379_v16 = vrot.slane %v922_v9, 6 }
 0x16c   :  { %v1491_v10 = vadd.f32 %v1456_v47, %v1411_v57  ;;  %v1252_v11 = vadd.f32 %v1218_v56, %v4104_v28  ;;  %v1298_v0 = vsel %vm1273_vm4, %v1295_v39, %v1297_v59  ;;  %v1458_v14 = vsel %vm1433_vm6, %v1455_v19, %v1457_v1  ;;  %3491 = vmatpush3.bf16.msra.mxu0 %v1539_v3 }
 0x16d   :  { %v1220_v15 = vsel %vm1193_vm3, %v1217_v50, %v1219_v5  ;;  %v1299_v22 = vrot.slane %v811_v4, 5  ;;  %v1459_v21 = vrot.slane %v924_v13, 7  ;;  %v1513_v23 = vadd.f32 %v4138_v6, %v1490_v53 }
 0x16e   :  { %v1332_v17 = vadd.f32 %v1298_v0, %v1252_v11  ;;  %v1253_v20 = vadd.f32 %v1220_v15, %v4106_v35  ;;  %v1380_v24 = vsel %vm1353_vm5, %v1377_v58, %v1379_v16  ;;  %v1514_v35 = vadd.f32 %v4138_v6, %v1491_v10 }
 0x16f   :  { %v1300_v28 = vsel %vm1273_vm4, %v1297_v59, %v1299_v22  ;;  %v1460_v26 = vsel %vm1433_vm6, %v1457_v1, %v1459_v21  ;;  %v1529_v30 = vmax.f32 %v1513_v23, 0.0  ;;  %v1724_v23 = vld [vmem:[%s4683_s4 + $0x8] sm:$0xff] }
 0x170   :  { %v1412_v46 = vadd.f32 %v1378_v12, %v1332_v17  ;;  %v1333_v25 = vadd.f32 %v1300_v28, %v1253_v20  ;;  %v815_v29 = vpop.f32.mrb[60].mxu0  ;;  %v928_v31 = vpop.f32.mrb[60].mxu1  ;;  %v1530_v3 = vmax.f32 %v1514_v35, 0.0  ;;  %v1728_v28 = vld [vmem:[%s4683_s4 + $0x28] sm:$0xff]  ;;  %v3570_v35 = vld [vmem:[%s4682_s3 + $0x20] sm:$0xff]  }
 0x171   :  { %v1221_v18 = vrot.slane %v815_v29, 4  ;;  %v817_v32 = vpop.f32.mrb[61].mxu0  ;;  %v1381_v54 = vrot.slane %v928_v31, 6  ;;  %v930_v39 = vpop.f32.mrb[61].mxu1  ;;  %v1540_v42 = vpack.c.bf16 %v1529_v30, %v1528_v33  ;;  %v3567_v29 = vld [vmem:[%s4682_s3 + $0x8] sm:$0xff]   ;;  %v3568_v30 = vld [vmem:[%s4682_s3 + $0x10] sm:$0xff]  }
 0x172   :  { %v1492_v34 = vadd.f32 %v1458_v14, %v1412_v46  ;;  %v1413_v36 = vadd.f32 %v1380_v24, %v1333_v25  ;;  %v1301_v38 = vrot.slane %v817_v32, 5  ;;  %v819_v40 = vpop.f32.mrb[62].mxu0  ;;  %v1461_v37 = vrot.slane %v930_v39, 7  ;;  %v932_v43 = vpop.f32.mrb[62].mxu1  ;;  %v3569_v33 = vld [vmem:[%s4682_s3 + $0x18] sm:$0xff]   ;;  %v1744_v39 = vld [vmem:[%s4683_s4 + $0xa8] sm:$0xff] }
 0x173   :  { %v1222_v41 = vsel %vm1193_vm3, %v1219_v5, %v1221_v18  ;;  %v1223_v19 = vrot.slane %v819_v40, 4  ;;  %v821_v55 = vpop.f32.mrb[63].mxu0  ;;  %v1382_v47 = vsel %vm1353_vm5, %v1379_v16, %v1381_v54  ;;  %v934_v49 = vpop.f32.mrb[63].mxu1  ;;  %3492 = vmatprep.subr.bf16.mxu0 %v1540_v42  ;;  %v1383_v57 = vrot.slane %v932_v43, 6  ;;  %v1748_v43 = vld [vmem:[%s4683_s4 + $0xc8] sm:$0xff] }
 0x174   :  { %v1493_v44 = vadd.f32 %v1460_v26, %v1413_v36  ;;  %v1254_v45 = vadd.f32 %v1222_v41, %v4114_v60  ;;  %v1302_v48 = vsel %vm1273_vm4, %v1299_v22, %v1301_v38  ;;  %v1462_v50 = vsel %vm1433_vm6, %v1459_v21, %v1461_v37  ;;  %3493 = vmatpush3.bf16.msra.mxu0 %v1540_v42  ;;  %v1736_v26 = vld [vmem:[%s4683_s4 + $0x68] sm:$0xff]  ;;  %v3572_v36 = vld [vmem:[%s4682_s3 + $0x30] sm:$0xff]  }
 0x175   :  { %v1224_v51 = vsel %vm1193_vm3, %v1221_v18, %v1223_v19  ;;  %v1256_v52 = vadd.f32 %v1223_v19, %v4116_v63  ;;  %v1303_v27 = vrot.slane %v821_v55, 5  ;;  %v1463_v58 = vrot.slane %v934_v49, 7  ;;  %v1759_v19 = vld [vmem:[%s4683_s4 + $0x120] sm:$0xff]  ;;  %v1760_v49 = vld [vmem:[%s4683_s4 + $0x128] sm:$0xff] }
 0x176   :  { %v1334_v2 = vadd.f32 %v1302_v48, %v1254_v45  ;;  %v1255_v53 = vadd.f32 %v1224_v51, %v4118_v7  ;;  %v1515_v61 = vadd.f32 %v4138_v6, %v1492_v34  ;;  %v1384_v1 = vsel %vm1353_vm5, %v1381_v54, %v1383_v57  ;;  %v3571_v34 = vld [vmem:[%s4682_s3 + $0x28] sm:$0xff]   ;;  %v3573_v54 = vld [vmem:[%s4682_s3 + $0x38] sm:$0xff]   ;;  %s3687_s3 = smov [#allocation2]  }
 0x177   :  { %v1304_v60 = vsel %vm1273_vm4, %v1301_v38, %v1303_v27  ;;  %v1336_v59 = vadd.f32 %v1303_v27, %v1256_v52  ;;  %v1464_v5 = vsel %vm1433_vm6, %v1461_v37, %v1463_v58  ;;  %v1516_v7 = vadd.f32 %v4138_v6, %v1493_v44  ;;  %v1740_v38 = vld [vmem:[%s4683_s4 + $0x88] sm:$0xff]  ;;  %v1755_v37 = vld [vmem:[%s4683_s4 + $0x100] sm:$0xff] }
 0x178   :  { %v1414_v62 = vadd.f32 %v1382_v47, %v1334_v2  ;;  %v1335_v56 = vadd.f32 %v1304_v60, %v1255_v53  ;;  %v1531_v4 = vmax.f32 %v1515_v61, 0.0  ;;  %v3320_v25 = vcombine.high %v1724_v23, %v1728_v28  ;;  %v1752_v44 = vld [vmem:[%s4683_s4 + $0xe8] sm:$0xff]  ;;  %v1763_v52 = vld [vmem:[%s4683_s4 + $0x140] sm:$0xff] }
 0x179   :  { %v1416_v63 = vadd.f32 %v1383_v57, %v1336_v59  ;;  %v1532_v15 = vmax.f32 %v1516_v7, 0.0  ;;  %v3319_v18 = vcombine.low %v1724_v23, %v1728_v28  ;;  %v3335_v40 = vcombine.low %v1740_v38, %v1744_v39  ;;  %v1756_v48 = vld [vmem:[%s4683_s4 + $0x108] sm:$0xff]  ;;  %v1767_v27 = vld [vmem:[%s4683_s4 + $0x160] sm:$0xff] }
 0x17a   :  { %v1494_v9 = vadd.f32 %v1462_v50, %v1414_v62  ;;  %v1415_v10 = vadd.f32 %v1384_v1, %v1335_v56  ;;  %v1541_v12 = vpack.c.bf16 %v1531_v4, %v1530_v3  ;;  %v3336_v41 = vcombine.high %v1740_v38, %v1744_v39  ;;  %v1764_v57 = vld [vmem:[%s4683_s4 + $0x148] sm:$0xff]  ;;  %v1771_v61 = vld [vmem:[%s4683_s4 + $0x180] sm:$0xff] }
 0x17b   :  { %v1496_v11 = vadd.f32 %v1463_v58, %v1416_v63  ;;  %v3349_v42 = vcombine.low %v1755_v37, %v1759_v19  ;;  %v3350_v55 = vcombine.high %v1755_v37, %v1759_v19  ;;  %v3343_v45 = vcombine.low %v1748_v43, %v1752_v44  ;;  %v1768_v58 = vld [vmem:[%s4683_s4 + $0x168] sm:$0xff]  ;;  %v1775_v62 = vld [vmem:[%s4683_s4 + $0x1a0] sm:$0xff] }
 0x17c   :  { %v1495_v0 = vadd.f32 %v1464_v5, %v1415_v10  ;;  %v1517_v13 = vadd.f32 %v4138_v6, %v1494_v9  ;;  %3494 = vmatprep.subr.bf16.mxu0 %v1541_v12  ;;  %v3344_v47 = vcombine.high %v1748_v43, %v1752_v44  ;;  %v3352_v50 = vcombine.high %v1756_v48, %v1760_v49  ;;  %v1772_v56 = vld [vmem:[%s4683_s4 + $0x188] sm:$0xff]  ;;  %v1779_v9 = vld [vmem:[%s4683_s4 + $0x1c0] sm:$0xff] }
 0x17d   :  { %v1519_v14 = vadd.f32 %v4138_v6, %v1496_v11  ;;  %3495 = vmatpush3.bf16.msra.mxu0 %v1541_v12  ;;  %2115 = vmatprep.subr.bf16.mxu1 %v3350_v55  ;;  %v3351_v51 = vcombine.low %v1756_v48, %v1760_v49  ;;  %v3357_v2 = vcombine.low %v1763_v52, %v1767_v27  ;;  %v1776_v63 = vld [vmem:[%s4683_s4 + $0x1a8] sm:$0xff]  ;;  %v1783_v10 = vld [vmem:[%s4683_s4 + $0x1e0] sm:$0xff]  ;;  %v1737_v49 = vld [vmem:[%s4683_s4 + $0x70] sm:$0xff] }
 0x17e   :  { %v1533_v22 = vmax.f32 %v1517_v13, 0.0  ;;  %v1518_v16 = vadd.f32 %v4138_v6, %v1495_v0  ;;  %v1732_v6 = vld [vmem:[%s4683_s4 + $0x48] sm:$0xff]  ;;  %2116 = vmatpush1.bf16.msra.mxu1 %v3349_v42  ;;  %v3358_v53 = vcombine.high %v1763_v52, %v1767_v27  ;;  %v3359_v60 = vcombine.low %v1764_v57, %v1768_v58 }
 0x17f   :  { %v1535_v17 = vmax.f32 %v1519_v14, 0.0  ;;  %v3328_v31 = vcombine.high %v1732_v6, %v1736_v26  ;;  %v3327_v32 = vcombine.low %v1732_v6, %v1736_v26  ;;  %v3360_v59 = vcombine.high %v1764_v57, %v1768_v58  ;;  %v1780_v7 = vld [vmem:[%s4683_s4 + $0x1c8] sm:$0xff]  ;;  %v1741_v58 = vld [vmem:[%s4683_s4 + $0x90] sm:$0xff] }
 0x180   :  { %v1542_v20 = vpack.c.bf16 %v1533_v22, %v1532_v15  ;;  %v1534_v21 = vmax.f32 %v1518_v16, 0.0  ;;  %2117 = vmatprep.subr.bf16.mxu1 %v3358_v53  ;;  %v3365_v1 = vcombine.low %v1771_v61, %v1775_v62  ;;  %v3366_v5 = vcombine.high %v1771_v61, %v1775_v62  ;;  %v1784_v12 = vld [vmem:[%s4683_s4 + $0x1e8] sm:$0xff]  ;;  %v1725_v15 = vld [vmem:[%s4683_s4 + $0x10] sm:$0xff]  ;;  %v1726_v16 = vld [vmem:[%s4683_s4 + $0x18] sm:$0xff] }
 0x181   :  { %v3368_v3 = vcombine.high %v1772_v56, %v1776_v63  ;;  %v3367_v4 = vcombine.low %v1772_v56, %v1776_v63  ;;  %v3374_v11 = vcombine.high %v1779_v9, %v1783_v10  ;;  %v3373_v0 = vcombine.low %v1779_v9, %v1783_v10  ;;  %v1729_v22 = vld [vmem:[%s4683_s4 + $0x30] sm:$0xff]  ;;  %v1746_v61 = vld [vmem:[%s4683_s4 + $0xb8] sm:$0xff] }
 0x182   :  { %3496 = vmatprep.subr.bf16.mxu0 %v1542_v20  ;;  %v1543_v24 = vpack.c.bf16 %v1535_v17, %v1534_v21  ;;  %2118 = vmatpush1.bf16.msra.mxu1 %v3357_v2  ;;  %v3375_v13 = vcombine.low %v1780_v7, %v1784_v12  ;;  %v3376_v14 = vcombine.high %v1780_v7, %v1784_v12  ;;  %v1730_v21 = vld [vmem:[%s4683_s4 + $0x38] sm:$0xff]  ;;  %v1749_v63 = vld [vmem:[%s4683_s4 + $0xd0] sm:$0xff] }
 0x183   :  { %3497 = vmatpush3.bf16.msra.mxu0 %v1542_v20  ;;  %2119 = vmatprep.subr.bf16.mxu1 %v3366_v5  ;;  %v3321_v17 = vcombine.low %v1725_v15, %v1729_v22  ;;  %v3322_v20 = vcombine.high %v1725_v15, %v1729_v22  ;;  %v3323_v23 = vcombine.low %v1726_v16, %v1730_v21  ;;  %v1754_v9 = vld [vmem:[%s4683_s4 + $0xf8] sm:$0xff] }
 0x184   :  { %v1547_v46 = vsel %vm1546_vm8, %v1543_v24, 0  ;;  %v3324_v28 = vcombine.high %v1726_v16, %v1730_v21  ;;  %v1762_v15 = vld [vmem:[%s4683_s4 + $0x138] sm:$0xff]  ;;  %v1765_v21 = vld [vmem:[%s4683_s4 + $0x150] sm:$0xff] }
 0x185   :  { %3498 = vmatprep.subr.bf16.mxu0 %v1547_v46 }
 0x186   :  { %2120 = vmatpush1.bf16.msra.mxu1 %v3365_v1 }
 0x187   :  { %3499 = vmatpush3.bf16.msra.mxu0 %v1547_v46  ;;  %2121 = vmatprep.subr.bf16.mxu1 %v3374_v11 }
 0x188   :  { %2160 = vmatprep.subr.bf16.mxu0 %v3320_v25 }
 0x18a   :  { %3501 = vmatmul.mubr.bf16.vlgmr.msra.gmra.mrb[64].mxu0 %v3567_v29  ;;  %2122 = vmatpush1.bf16.msra.mxu1 %v3373_v0  ;;  %v1757_v0 = vld [vmem:[%s4683_s4 + $0x110] sm:$0xff] }
 0x18b   :  { %3504 = vmatprep.mubr.bf16.mxu0 %v3568_v30  ;;  %2161 = vmatpush1.bf16.msra.mxu0 %v3319_v18 }
 0x18c   :  { %2162 = vmatprep.subr.bf16.mxu0 %v3328_v31  ;;  %2213 = vmatprep.subr.bf16.mxu1 %v3322_v20 }
 0x18f   :  { %2163 = vmatpush1.bf16.msra.mxu0 %v3327_v32 }
 0x190   :  { %2164 = vmatprep.subr.bf16.mxu0 %v3336_v41 }
 0x192   :  { %3505 = vmatmul.mubr.bf16.gmra.mrb[68].mxu0 %v3569_v33 }
 0x193   :  { %3508 = vmatprep.mubr.bf16.mxu0 %v3570_v35  ;;  %2165 = vmatpush1.bf16.msra.mxu0 %v3335_v40 }
 0x194   :  { %2166 = vmatprep.subr.bf16.mxu0 %v3344_v47 }
 0x197   :  { %2167 = vmatpush1.bf16.msra.mxu0 %v3343_v45  ;;  %v1733_v45 = vld [vmem:[%s4683_s4 + $0x50] sm:$0xff] }
 0x198   :  { %2168 = vmatprep.subr.bf16.mxu0 %v3352_v50  ;;  %v1734_v50 = vld [vmem:[%s4683_s4 + $0x58] sm:$0xff]  ;;  %v3330_v53 = vcombine.high %v1733_v45, %v1737_v49  ;;  %v3329_v62 = vcombine.low %v1733_v45, %v1737_v49  ;;  %v3576_v45 = vld [vmem:[%s4685_s6 + $0x10] sm:$0xff]   ;;  %v3579_v49 = vld [vmem:[%s4685_s6 + $0x28] sm:$0xff]  }
 0x19a   :  { %3509 = vmatmul.mubr.bf16.gmra.mrb[72].mxu0 %v3571_v34 }
 0x19b   :  { %3512 = vmatprep.mubr.bf16.mxu0 %v3572_v36  ;;  %2169 = vmatpush1.bf16.msra.mxu0 %v3351_v51  ;;  %v1738_v51 = vld [vmem:[%s4683_s4 + $0x78] sm:$0xff] }
 0x19c   :  { %2170 = vmatprep.subr.bf16.mxu0 %v3360_v59  ;;  %v3332_v57 = vcombine.high %v1734_v50, %v1738_v51  ;;  %v1742_v59 = vld [vmem:[%s4683_s4 + $0x98] sm:$0xff]  ;;  %v3331_v56 = vcombine.low %v1734_v50, %v1738_v51  ;;  %v3580_v50 = vld [vmem:[%s4685_s6 + $0x30] sm:$0xff]  }
 0x19d   :  { %v3340_v5 = vcombine.high %v1742_v59, %v1746_v61  ;;  %v3339_v7 = vcombine.low %v1742_v59, %v1746_v61  ;;  %v3581_v51 = vld [vmem:[%s4685_s6 + $0x38] sm:$0xff]   ;;  %v3602_v59 = vld [vmem:[%s4687_s8 + $0xac] ss:$28 sps:$4 sm:$0xff]  }
 0x19e   :  { %v3600_v61 = vld [vmem:[%s4687_s8 + $0xa8] ss:$28 sps:$4 sm:$0xff]  }
 0x19f   :  { %2171 = vmatpush1.bf16.msra.mxu0 %v3359_v60  ;;  %v1745_v60 = vld [vmem:[%s4683_s4 + $0xb0] sm:$0xff] }
 0x1a0   :  { %2172 = vmatprep.subr.bf16.mxu0 %v3368_v3  ;;  %v3338_v1 = vcombine.high %v1741_v58, %v1745_v60  ;;  %v1753_v3 = vld [vmem:[%s4683_s4 + $0xf0] sm:$0xff]  ;;  %v3337_v10 = vcombine.low %v1741_v58, %v1745_v60 }
 0x1a1   :  { %v3346_v11 = vcombine.high %v1749_v63, %v1753_v3  ;;  %v3345_v22 = vcombine.low %v1749_v63, %v1753_v3  ;;  %v3596_v58 = vld [vmem:[%s4687_s8 + $0x74] ss:$28 sps:$4 sm:$0xff]  }
 0x1a2   :  { %3513 = vmatmul.mubr.bf16.gmra.mrb[76].mxu0 %v3573_v54  ;;  %v3594_v60 = vld [vmem:[%s4687_s8 + $0x70] ss:$28 sps:$4 sm:$0xff]  }
 0x1a3   :  { %2192 = vmatprep.mubr.bf16.mxu0 %v3686_v8  ;;  %2173 = vmatpush1.bf16.msra.mxu0 %v3367_v4  ;;  %v1750_v4 = vld [vmem:[%s4683_s4 + $0xd8] sm:$0xff]  ;;  %v3620_v63 = vld [vmem:[%s4687_s8 + $0x154] ss:$28 sps:$4 sm:$0xff]  }
 0x1a4   :  { %2174 = vmatprep.subr.bf16.mxu0 %v3376_v14  ;;  %v3348_v12 = vcombine.high %v1750_v4, %v1754_v9  ;;  %v1758_v14 = vld [vmem:[%s4683_s4 + $0x118] sm:$0xff]  ;;  %v3347_v16 = vcombine.low %v1750_v4, %v1754_v9  ;;  %v3618_v3 = vld [vmem:[%s4687_s8 + $0x150] ss:$28 sps:$4 sm:$0xff]  }
 0x1a5   :  { %v3356_v20 = vcombine.high %v1758_v14, %v1762_v15 }
 0x1a7   :  { %2175 = vmatpush1.bf16.msra.mxu0 %v3375_v13  ;;  %v1761_v13 = vld [vmem:[%s4683_s4 + $0x130] sm:$0xff] }
 0x1a8   :  { %2266 = vmatprep.subr.bf16.mxu0 %v3324_v28  ;;  %v1766_v28 = vld [vmem:[%s4683_s4 + $0x158] sm:$0xff] }
 0x25d   :  { %v3502_v24 = vpop.f32.mrb[64].mxu0 }
 0x25e   :  { %v1646_v46 = vpop.f32.mrb[65].mxu0 }
 0x25f   :  { %v3503_v25 = vpop.f32.mrb[66].mxu0 }
 0x260   :  { %v1649_v6 = vpop.f32.mrb[67].mxu0 }
 0x265   :  { %v3506_v26 = vpop.f32.mrb[68].mxu0 }
 0x266   :  { %v1711_v29 = vmax.f32 %v3502_v24, %v3506_v26  ;;  %v1662_v30 = vpop.f32.mrb[69].mxu0  ;;  %v1770_v24 = vld [vmem:[%s4683_s4 + $0x178] sm:$0xff] }
 0x267   :  { %v1709_v18 = vmax.f32 %v1646_v46, %v1662_v30  ;;  %v3507_v31 = vpop.f32.mrb[70].mxu0  ;;  %v3353_v46 = vcombine.low %v1757_v0, %v1761_v13  ;;  %v3364_v26 = vcombine.high %v1766_v28, %v1770_v24  ;;  %v1777_v30 = vld [vmem:[%s4683_s4 + $0x1b0] sm:$0xff] }
 0x268   :  { %v1712_v32 = vmax.f32 %v3503_v25, %v3507_v31  ;;  %v1665_v33 = vpop.f32.mrb[71].mxu0  ;;  %v3355_v25 = vcombine.low %v1758_v14, %v1762_v15  ;;  %v1778_v31 = vld [vmem:[%s4683_s4 + $0x1b8] sm:$0xff] }
 0x269   :  { %v1710_v35 = vmax.f32 %v1649_v6, %v1665_v33  ;;  %v3363_v33 = vcombine.low %v1766_v28, %v1770_v24 }
 0x26d   :  { %v3510_v34 = vpop.f32.mrb[72].mxu0 }
 0x26e   :  { %v1715_v36 = vmax.f32 %v1711_v29, %v3510_v34  ;;  %v1678_v54 = vpop.f32.mrb[73].mxu0  ;;  %v1773_v29 = vld [vmem:[%s4683_s4 + $0x190] sm:$0xff] }
 0x26f   :  { %v1713_v38 = vmax.f32 %v1709_v18, %v1678_v54  ;;  %v3511_v39 = vpop.f32.mrb[74].mxu0  ;;  %v1774_v18 = vld [vmem:[%s4683_s4 + $0x198] sm:$0xff]  ;;  %v1785_v54 = vld [vmem:[%s4683_s4 + $0x1f0] sm:$0xff] }
 0x270   :  { %v1716_v40 = vmax.f32 %v1712_v32, %v3511_v39  ;;  %v1681_v41 = vpop.f32.mrb[75].mxu0  ;;  %v3372_v34 = vcombine.high %v1774_v18, %v1778_v31  ;;  %v1786_v39 = vld [vmem:[%s4683_s4 + $0x1f8] sm:$0xff] }
 0x271   :  { %v1714_v37 = vmax.f32 %v1710_v35, %v1681_v41  ;;  %v3370_v35 = vcombine.high %v1773_v29, %v1777_v30  ;;  %v3371_v41 = vcombine.low %v1774_v18, %v1778_v31 }
 0x275   :  { %v3514_v19 = vpop.f32.mrb[76].mxu0 }
 0x276   :  { %v1719_v42 = vmax.f32 %v1715_v36, %v3514_v19  ;;  %v1694_v55 = vpop.f32.mrb[77].mxu0  ;;  %v1781_v36 = vld [vmem:[%s4683_s4 + $0x1d0] sm:$0xff] }
 0x277   :  { %v1717_v43 = vmax.f32 %v1713_v38, %v1694_v55  ;;  %v3515_v44 = vpop.f32.mrb[78].mxu0  ;;  %v1782_v38 = vld [vmem:[%s4683_s4 + $0x1d8] sm:$0xff] }
 0x278   :  { %v1720_v47 = vmax.f32 %v1716_v40, %v3515_v44  ;;  %v1697_v48 = vpop.f32.mrb[79].mxu0  ;;  %v3369_v40 = vcombine.low %v1773_v29, %v1777_v30  ;;  %v3380_v19 = vcombine.high %v1782_v38, %v1786_v39  ;;  %v3379_v55 = vcombine.low %v1782_v38, %v1786_v39  ;;  %v3575_v44 = vld [vmem:[%s4685_s6 + $0x8] sm:$0xff]  }
 0x279   :  { %v1718_v52 = vmax.f32 %v1714_v37, %v1697_v48  ;;  %v3378_v37 = vcombine.high %v1781_v36, %v1785_v54  ;;  %v3578_v48 = vld [vmem:[%s4685_s6 + $0x20] sm:$0xff]  }
 0x27a   :  { %v4336_v27 = vpack.c.bf16 %v1720_v47, %v1719_v42  ;;  %v3377_v42 = vcombine.low %v1781_v36, %v1785_v54  ;;  %v3577_v47 = vld [vmem:[%s4685_s6 + $0x18] sm:$0xff]  }
 0x27b   :  { %v4338_v2 = vpack.c.bf16 %v1718_v52, %v1717_v43  ;;  %v3574_v43 = vld [vmem:[%s4685_s6] sm:$0xff]   ;;  %s3228_s6 = sshll.u32 %s3687_s3, 4  ;;  %s3229_s6 = int_to_ptr.vmem [resolvable:$true] %s3228_s6 }
 0x27c   :  { %v3582_v52 = vld [vmem:[%s4687_s8] ss:$28 sps:$4 sm:$0xff]   ;;  %s3662_s17 = scalar_lea.vmem %s3229_s6, 32  ;;  %p3667_p1 = scmp.lt.s32.totalorder %s3229_s6, %s3229_s6 }
 0x27d   :  { %2140 = vmatmul.mubr.bf16.vlgmr.msra.gmra.mrb[64].mxu1 %v4338_v2  ;;  %2193 = vmatmul.mubr.bf16.vlgmr.msra.gmra.mrb[80].mxu0 %v4338_v2  ;;  %p3663_p0 = scmp.ne.s32.totalorder %s3229_s6, %s3662_s17  ;;  %p3668_p2 = scmp.lt.s32.totalorder %s3662_s17, %s3662_s17 }
 0x27e   :  { %2214 = vmatpush1.bf16.msra.mxu1 %v3321_v17  ;;  %2267 = vmatpush1.bf16.msra.mxu0 %v3323_v23  ;;  %v3354_v17 = vcombine.high %v1757_v0, %v1761_v13  ;;  %v1769_v23 = vld [vmem:[%s4683_s4 + $0x170] sm:$0xff] }
 0x27f   :  { %2215 = vmatprep.subr.bf16.mxu1 %v3330_v53  ;;  %2268 = vmatprep.subr.bf16.mxu0 %v3332_v57  ;;  %v3362_v6 = vcombine.high %v1765_v21, %v1769_v23  ;;  %v3361_v32 = vcombine.low %v1765_v21, %v1769_v23  ;;  %v3590_v53 = vld [vmem:[%s4687_s8 + $0x3c] ss:$28 sps:$4 sm:$0xff]   ;;  %p3669_p3 = por %p3668_p2, %p3667_p1 }
 0x280   :  { %2149 = vmatprep.mubr.bf16.mxu1 %v3686_v8  ;;  %2202 = vmatprep.mubr.bf16.mxu0 %v3686_v8  ;;  %v3588_v57 = vld [vmem:[%s4687_s8 + $0x38] ss:$28 sps:$4 sm:$0xff]  }
 0x281   :  { %p3670_p4 = pnand %p3669_p3, %p3663_p0 }
 0x282   :  { %2216 = vmatpush1.bf16.msra.mxu1 %v3329_v62  ;;  %2269 = vmatpush1.bf16.msra.mxu0 %v3331_v56  ;;  %v3608_v62 = vld [vmem:[%s4687_s8 + $0xe4] ss:$28 sps:$4 sm:$0xff]  }
 0x283   :  { %2217 = vmatprep.subr.bf16.mxu1 %v3338_v1  ;;  %2270 = vmatprep.subr.bf16.mxu0 %v3340_v5  ;;  %v3606_v56 = vld [vmem:[%s4687_s8 + $0xe0] ss:$28 sps:$4 sm:$0xff]   ;;  %v3612_v5 = vld [vmem:[%s4687_s8 + $0x118] ss:$28 sps:$4 sm:$0xff]  }
 0x284   :  { %v3614_v1 = vld [vmem:[%s4687_s8 + $0x11c] ss:$28 sps:$4 sm:$0xff]  }
 0x285   :  { %2150 = vmatmul.mubr.bf16.gmra.mrb[68].mxu1 %v4336_v27  ;;  %2203 = vmatmul.mubr.bf16.gmra.mrb[84].mxu0 %v4336_v27 }
 0x286   :  { %2218 = vmatpush1.bf16.msra.mxu1 %v3337_v10  ;;  %2271 = vmatpush1.bf16.msra.mxu0 %v3339_v7 }
 0x287   :  { %2219 = vmatprep.subr.bf16.mxu1 %v3346_v11  ;;  %2272 = vmatprep.subr.bf16.mxu0 %v3348_v12 }
 0x288   :  { %2245 = vmatprep.mubr.bf16.mxu1 %v3686_v8  ;;  %2298 = vmatprep.mubr.bf16.mxu0 %v3686_v8 }
 0x28a   :  { %2220 = vmatpush1.bf16.msra.mxu1 %v3345_v22  ;;  %2273 = vmatpush1.bf16.msra.mxu0 %v3347_v16 }
 0x28b   :  { %2221 = vmatprep.subr.bf16.mxu1 %v3354_v17  ;;  %2274 = vmatprep.subr.bf16.mxu0 %v3356_v20 }
 0x28e   :  { %2222 = vmatpush1.bf16.msra.mxu1 %v3353_v46  ;;  %2275 = vmatpush1.bf16.msra.mxu0 %v3355_v25 }
 0x28f   :  { %2223 = vmatprep.subr.bf16.mxu1 %v3362_v6  ;;  %2276 = vmatprep.subr.bf16.mxu0 %v3364_v26 }
 0x292   :  { %2224 = vmatpush1.bf16.msra.mxu1 %v3361_v32  ;;  %2277 = vmatpush1.bf16.msra.mxu0 %v3363_v33 }
 0x293   :  { %2225 = vmatprep.subr.bf16.mxu1 %v3370_v35  ;;  %2278 = vmatprep.subr.bf16.mxu0 %v3372_v34 }
 0x296   :  { %2226 = vmatpush1.bf16.msra.mxu1 %v3369_v40  ;;  %2279 = vmatpush1.bf16.msra.mxu0 %v3371_v41 }
 0x297   :  { %2227 = vmatprep.subr.bf16.mxu1 %v3378_v37  ;;  %2280 = vmatprep.subr.bf16.mxu0 %v3380_v19 }
 0x29a   :  { %2228 = vmatpush1.bf16.msra.mxu1 %v3377_v42  ;;  %2281 = vmatpush1.bf16.msra.mxu0 %v3379_v55 }
 0x29b   :  { %3516 = vmatprep.subr.bf16.mxu1 %v3574_v43 }
 0x29d   :  { %2246 = vmatmul.mubr.bf16.vlgmr.msra.gmra.mrb[72].mxu1 %v4338_v2  ;;  %2299 = vmatmul.mubr.bf16.vlgmr.msra.gmra.mrb[88].mxu0 %v4338_v2  ;;  %v3587_v2 = vld [vmem:[%s4687_s8 + $0xc] ss:$28 sps:$4 sm:$0xff]  }
 0x29e   :  { %2255 = vmatprep.mubr.bf16.mxu1 %v3686_v8  ;;  %2308 = vmatprep.mubr.bf16.mxu0 %v3686_v8 }
 0x29f   :  { %3517 = vmatpush3.bf16.msra.mxu1 %v3574_v43 }
 0x2a0   :  { %3518 = vmatprep.subr.bf16.mxu1 %v3575_v44 }
 0x2a3   :  { %3519 = vmatpush3.bf16.msra.mxu1 %v3575_v44 }
 0x2a4   :  { %3520 = vmatprep.subr.bf16.mxu1 %v3576_v45 }
 0x2a5   :  { %2256 = vmatmul.mubr.bf16.gmra.mrb[76].mxu1 %v4336_v27  ;;  %2309 = vmatmul.mubr.bf16.gmra.mrb[92].mxu0 %v4336_v27  ;;  %v3584_v27 = vld [vmem:[%s4687_s8 + $0x4] ss:$28 sps:$4 sm:$0xff]  }
 0x2a6   :  { %2975 = vmatprep.mubr.bf16.mxu0 %v3686_v8  ;;  %2943 = vmatprep.subr.bf16.mxu0 %v3584_v27 }
 0x2a7   :  { %3521 = vmatpush3.bf16.msra.mxu1 %v3576_v45  ;;  %2944 = vmatpush1.bf16.msra.mxu0 %v3582_v52 }
 0x2a8   :  { %3522 = vmatprep.subr.bf16.mxu1 %v3577_v47  ;;  %2945 = vmatprep.subr.bf16.mxu0 %v3590_v53 }
 0x2ab   :  { %3523 = vmatpush3.bf16.msra.mxu1 %v3577_v47  ;;  %2946 = vmatpush1.bf16.msra.mxu0 %v3588_v57 }
 0x2ac   :  { %3524 = vmatprep.subr.bf16.mxu1 %v3578_v48  ;;  %2947 = vmatprep.subr.bf16.mxu0 %v3596_v58 }
 0x2af   :  { %3525 = vmatpush3.bf16.msra.mxu1 %v3578_v48  ;;  %2948 = vmatpush1.bf16.msra.mxu0 %v3594_v60 }
 0x2b0   :  { %3526 = vmatprep.subr.bf16.mxu1 %v3579_v49  ;;  %2949 = vmatprep.subr.bf16.mxu0 %v3602_v59 }
 0x2b3   :  { %3527 = vmatpush3.bf16.msra.mxu1 %v3579_v49  ;;  %2950 = vmatpush1.bf16.msra.mxu0 %v3600_v61 }
 0x2b4   :  { %3528 = vmatprep.subr.bf16.mxu1 %v3580_v50  ;;  %2951 = vmatprep.subr.bf16.mxu0 %v3608_v62 }
 0x2b7   :  { %3529 = vmatpush3.bf16.msra.mxu1 %v3580_v50  ;;  %2952 = vmatpush1.bf16.msra.mxu0 %v3606_v56 }
 0x2b8   :  { %3530 = vmatprep.subr.bf16.mxu1 %v3581_v51  ;;  %2953 = vmatprep.subr.bf16.mxu0 %v3614_v1 }
 0x2bb   :  { %3531 = vmatpush3.bf16.msra.mxu1 %v3581_v51  ;;  %2954 = vmatpush1.bf16.msra.mxu0 %v3612_v5 }
 0x2bc   :  { %2993 = vmatprep.subr.bf16.mxu1 %v3587_v2  ;;  %2955 = vmatprep.subr.bf16.mxu0 %v3620_v63 }
 0x2bf   :  { %2956 = vmatpush1.bf16.msra.mxu0 %v3618_v3 }
 0x350   :  { %v2141_v4 = vpop.f32.mrb[64].mxu1  ;;  %v2194_v9 = vpop.f32.mrb[80].mxu0 }
 0x351   :  { %v2143_v10 = vpop.f32.mrb[65].mxu1  ;;  %v2196_v7 = vpop.f32.mrb[81].mxu0  ;;  %v2342_v0 = vrot.slane %v2194_v9, 2 }
 0x352   :  { %v2145_v11 = vpop.f32.mrb[66].mxu1  ;;  %v2198_v12 = vpop.f32.mrb[82].mxu0  ;;  %v2323_v22 = vrot.slane %v2143_v10, 1  ;;  %v2361_v16 = vrot.slane %v2196_v7, 3 }
 0x353   :  { %v2343_v13 = vrot.slane %v2198_v12, 2  ;;  %v2147_v14 = vpop.f32.mrb[67].mxu1  ;;  %v2200_v15 = vpop.f32.mrb[83].mxu0 }
 0x354   :  { %v2324_v17 = vrot.slane %v2147_v14, 1  ;;  %v2362_v20 = vrot.slane %v2200_v15, 3 }
 0x355   :  { %v2344_v21 = vsel %vm1033_vm1, %v2342_v0, %v2343_v13 }
 0x356   :  { %v2325_v23 = vsel %vm953_vm0, %v2323_v22, %v2324_v17  ;;  %v2363_v28 = vsel %vm1113_vm2, %v2361_v16, %v2362_v20 }
 0x357   :  { %v2334_v24 = vadd.f32 %v2325_v23, %v2141_v4 }
 0x358   :  { %v2151_v46 = vpop.f32.mrb[68].mxu1  ;;  %v2204_v25 = vpop.f32.mrb[84].mxu0 }
 0x359   :  { %v2353_v6 = vadd.f32 %v2344_v21, %v2334_v24  ;;  %v2345_v26 = vrot.slane %v2204_v25, 2  ;;  %v2153_v29 = vpop.f32.mrb[69].mxu1  ;;  %v2206_v30 = vpop.f32.mrb[85].mxu0 }
 0x35a   :  { %v2326_v18 = vrot.slane %v2153_v29, 1  ;;  %v2364_v31 = vrot.slane %v2206_v30, 3  ;;  %v2155_v32 = vpop.f32.mrb[70].mxu1  ;;  %v2208_v33 = vpop.f32.mrb[86].mxu0 }
 0x35b   :  { %v2372_v35 = vadd.f32 %v2363_v28, %v2353_v6  ;;  %v2346_v34 = vsel %vm1033_vm1, %v2343_v13, %v2345_v26  ;;  %v2347_v36 = vrot.slane %v2208_v33, 2  ;;  %v2157_v54 = vpop.f32.mrb[71].mxu1  ;;  %v2210_v38 = vpop.f32.mrb[87].mxu0 }
 0x35c   :  { %v2327_v39 = vsel %vm953_vm0, %v2324_v17, %v2326_v18  ;;  %v2365_v40 = vsel %vm1113_vm2, %v2362_v20, %v2364_v31  ;;  %v2328_v41 = vrot.slane %v2157_v54, 1  ;;  %v2366_v37 = vrot.slane %v2210_v38, 3 }
 0x35d   :  { %v2335_v19 = vadd.f32 %v2327_v39, %v2145_v11  ;;  %v2348_v42 = vsel %vm1033_vm1, %v2345_v26, %v2347_v36 }
 0x35e   :  { %v2329_v55 = vsel %vm953_vm0, %v2326_v18, %v2328_v41  ;;  %v2337_v43 = vadd.f32 %v2328_v41, %v2155_v32  ;;  %v2367_v44 = vsel %vm1113_vm2, %v2364_v31, %v2366_v37 }
 0x35f   :  { %v2354_v45 = vadd.f32 %v2346_v34, %v2335_v19  ;;  %v2336_v47 = vadd.f32 %v2329_v55, %v2151_v46 }
 0x360   :  { %v2356_v48 = vadd.f32 %v2347_v36, %v2337_v43 }
 0x361   :  { %v2373_v49 = vadd.f32 %v2365_v40, %v2354_v45  ;;  %v2355_v50 = vadd.f32 %v2348_v42, %v2336_v47  ;;  %v3381_v42 = vld [vmem:[%s4684_s5] ss:$0 sm:$0xff] }
 0x362   :  { %v2375_v51 = vadd.f32 %v2366_v37, %v2356_v48 }
 0x363   :  { %v2374_v52 = vadd.f32 %v2367_v44, %v2355_v50 }
 0x370   :  { %v2247_v27 = vpop.f32.mrb[72].mxu1  ;;  %v2300_v2 = vpop.f32.mrb[88].mxu0 }
 0x371   :  { %v2249_v53 = vpop.f32.mrb[73].mxu1  ;;  %v2302_v57 = vpop.f32.mrb[89].mxu0  ;;  %v2380_v59 = vrot.slane %v2247_v27, 4  ;;  %v2418_v61 = vrot.slane %v2300_v2, 6 }
 0x372   :  { %v2251_v58 = vpop.f32.mrb[74].mxu1  ;;  %v2304_v60 = vpop.f32.mrb[90].mxu0  ;;  %v2399_v63 = vrot.slane %v2249_v53, 5  ;;  %v2437_v3 = vrot.slane %v2302_v57, 7 }
 0x373   :  { %v2381_v62 = vrot.slane %v2251_v58, 4  ;;  %v2419_v56 = vrot.slane %v2304_v60, 6  ;;  %v2253_v1 = vpop.f32.mrb[75].mxu1  ;;  %v2306_v5 = vpop.f32.mrb[91].mxu0 }
 0x374   :  { %v2400_v4 = vrot.slane %v2253_v1, 5  ;;  %v2438_v9 = vrot.slane %v2306_v5, 7  ;;  %v3591_v1 = vld [vmem:[%s4687_s8 + $0x40] ss:$28 sps:$4 sm:$0xff]  }
 0x375   :  { %v2382_v10 = vsel %vm1193_vm3, %v2380_v59, %v2381_v62  ;;  %v2420_v7 = vsel %vm1353_vm5, %v2418_v61, %v2419_v56  ;;  %v3585_v61 = vld [vmem:[%s4687_s8 + $0x8] ss:$28 sps:$4 sm:$0xff]   ;;  %v3599_v5 = vld [vmem:[%s4687_s8 + $0x7c] ss:$28 sps:$4 sm:$0xff]  }
 0x376   :  { %v2391_v11 = vadd.f32 %v2382_v10, %v2372_v35  ;;  %v2401_v12 = vsel %vm1273_vm4, %v2399_v63, %v2400_v4  ;;  %v2439_v0 = vsel %vm1433_vm6, %v2437_v3, %v2438_v9  ;;  %v3597_v63 = vld [vmem:[%s4687_s8 + $0x78] ss:$28 sps:$4 sm:$0xff]   ;;  %v3609_v10 = vld [vmem:[%s4687_s8 + $0xe8] ss:$28 sps:$4 sm:$0xff]  }
 0x377   :  { %v3605_v3 = vld [vmem:[%s4687_s8 + $0xb4] ss:$28 sps:$4 sm:$0xff]  }
 0x378   :  { %v2410_v13 = vadd.f32 %v2401_v12, %v2391_v11  ;;  %v2257_v14 = vpop.f32.mrb[76].mxu1  ;;  %v2310_v15 = vpop.f32.mrb[92].mxu0  ;;  %v3615_v11 = vld [vmem:[%s4687_s8 + $0x120] ss:$28 sps:$4 sm:$0xff]  }
 0x379   :  { %v2383_v22 = vrot.slane %v2257_v14, 4  ;;  %v2421_v16 = vrot.slane %v2310_v15, 6  ;;  %v2259_v17 = vpop.f32.mrb[77].mxu1  ;;  %v2312_v20 = vpop.f32.mrb[93].mxu0  ;;  %v3623_v12 = vld [vmem:[%s4687_s8 + $0x15c] ss:$28 sps:$4 sm:$0xff]  }
 0x37a   :  { %v2429_v21 = vadd.f32 %v2420_v7, %v2410_v13  ;;  %v2402_v23 = vrot.slane %v2259_v17, 5  ;;  %v2440_v28 = vrot.slane %v2312_v20, 7  ;;  %v2261_v24 = vpop.f32.mrb[78].mxu1  ;;  %v2314_v46 = vpop.f32.mrb[94].mxu0  ;;  %v3617_v7 = vld [vmem:[%s4687_s8 + $0x124] ss:$28 sps:$4 sm:$0xff]  }
 0x37b   :  { %v2384_v25 = vsel %vm1193_vm3, %v2381_v62, %v2383_v22  ;;  %v2422_v6 = vsel %vm1353_vm5, %v2419_v56, %v2421_v16  ;;  %v2385_v26 = vrot.slane %v2261_v24, 4  ;;  %v2423_v29 = vrot.slane %v2314_v46, 6  ;;  %v2263_v30 = vpop.f32.mrb[79].mxu1  ;;  %v2316_v18 = vpop.f32.mrb[95].mxu0  ;;  %v3593_v56 = vld [vmem:[%s4687_s8 + $0x44] ss:$28 sps:$4 sm:$0xff]  }
 0x37c   :  { %v2448_v31 = vadd.f32 %v2439_v0, %v2429_v21  ;;  %v2392_v32 = vadd.f32 %v2384_v25, %v2373_v49  ;;  %v2403_v33 = vsel %vm1273_vm4, %v2400_v4, %v2402_v23  ;;  %v2441_v35 = vsel %vm1433_vm6, %v2438_v9, %v2440_v28  ;;  %v3603_v4 = vld [vmem:[%s4687_s8 + $0xb0] ss:$28 sps:$4 sm:$0xff]   ;;  %v3621_v0 = vld [vmem:[%s4687_s8 + $0x158] ss:$28 sps:$4 sm:$0xff]   ;;  %v3624_v15 = vld [vmem:[%s4687_s8 + $0x188] ss:$28 sps:$4 sm:$0xff]  }
 0x37d   :  { %v2386_v34 = vsel %vm1193_vm3, %v2383_v22, %v2385_v26  ;;  %v2394_v36 = vadd.f32 %v2385_v26, %v2375_v51  ;;  %v2424_v54 = vsel %vm1353_vm5, %v2421_v16, %v2423_v29  ;;  %v2404_v38 = vrot.slane %v2263_v30, 5  ;;  %v3611_v9 = vld [vmem:[%s4687_s8 + $0xec] ss:$28 sps:$4 sm:$0xff]   ;;  %v3629_v14 = vld [vmem:[%s4687_s8 + $0x194] ss:$28 sps:$4 sm:$0xff]  }
 0x37e   :  { %v2411_v39 = vadd.f32 %v2403_v33, %v2392_v32  ;;  %v2393_v40 = vadd.f32 %v2386_v34, %v2374_v52  ;;  %v2442_v41 = vrot.slane %v2316_v18, 7  ;;  %v2459_v49 = vadd.f32 %v3381_v42, %v2448_v31  ;;  %v3626_v13 = vld [vmem:[%s4687_s8 + $0x18c] ss:$28 sps:$4 sm:$0xff]   ;;  %v3632_v16 = vld [vmem:[%s4687_s8 + $0x14] ss:$28 sps:$4 sm:$0xff]  }
 0x37f   :  { %v2405_v37 = vsel %vm1273_vm4, %v2402_v23, %v2404_v38  ;;  %v2413_v19 = vadd.f32 %v2404_v38, %v2394_v36  ;;  %v3627_v22 = vld [vmem:[%s4687_s8 + $0x190] ss:$28 sps:$4 sm:$0xff]   ;;  %2957 = vmatprep.subr.bf16.mxu0 %v3626_v13  ;;  %v3633_v17 = vld [vmem:[%s4687_s8 + $0x18] ss:$28 sps:$4 sm:$0xff]   ;;  %v3382_v21 = vld [vmem:[%s4686_s7] ss:$0 sm:$0xff] }
 0x380   :  { %v2430_v55 = vadd.f32 %v2422_v6, %v2411_v39  ;;  %v2412_v43 = vadd.f32 %v2405_v37, %v2393_v40  ;;  %v2443_v44 = vsel %vm1433_vm6, %v2440_v28, %v2442_v41  ;;  %v2463_v53 = vmax.f32 %v2459_v49, 0.0  ;;  %2958 = vmatpush1.bf16.msra.mxu0 %v3624_v15  ;;  %v3630_v30 = vld [vmem:[%s4687_s8 + $0x10] ss:$28 sps:$4 sm:$0xff]   ;;  %v3634_v33 = vld [vmem:[%s4687_s8 + $0x48] ss:$28 sps:$4 sm:$0xff]  }
 0x381   :  { %v2432_v45 = vadd.f32 %v2423_v29, %v2413_v19  ;;  %3044 = vmatprep.subr.bf16.mxu0 %v3632_v16  ;;  %v3636_v31 = vld [vmem:[%s4687_s8 + $0x4c] ss:$28 sps:$4 sm:$0xff]   ;;  %v3638_v36 = vld [vmem:[%s4687_s8 + $0x80] ss:$28 sps:$4 sm:$0xff]   ;;  %v3642_v39 = vld [vmem:[%s4687_s8 + $0xb8] ss:$28 sps:$4 sm:$0xff]  }
 0x382   :  { %v2449_v47 = vadd.f32 %v2441_v35, %v2430_v55  ;;  %v2431_v48 = vadd.f32 %v2424_v54, %v2412_v43  ;;  %v3637_v32 = vld [vmem:[%s4687_s8 + $0x50] ss:$28 sps:$4 sm:$0xff]   ;;  %v3640_v35 = vld [vmem:[%s4687_s8 + $0x84] ss:$28 sps:$4 sm:$0xff]   ;;  %v3644_v54 = vld [vmem:[%s4687_s8 + $0xbc] ss:$28 sps:$4 sm:$0xff]  }
 0x383   :  { %v2451_v50 = vadd.f32 %v2442_v41, %v2432_v45  ;;  %v3641_v34 = vld [vmem:[%s4687_s8 + $0x88] ss:$28 sps:$4 sm:$0xff]   ;;  %v3645_v38 = vld [vmem:[%s4687_s8 + $0xc0] ss:$28 sps:$4 sm:$0xff]   ;;  %v3648_v40 = vld [vmem:[%s4687_s8 + $0xf4] ss:$28 sps:$4 sm:$0xff]  }
 0x384   :  { %v2450_v51 = vadd.f32 %v2443_v44, %v2431_v48  ;;  %v2460_v27 = vadd.f32 %v3381_v42, %v2449_v47  ;;  %v3649_v41 = vld [vmem:[%s4687_s8 + $0xf8] ss:$28 sps:$4 sm:$0xff]   ;;  %v3646_v37 = vld [vmem:[%s4687_s8 + $0xf0] ss:$28 sps:$4 sm:$0xff]   ;;  %v3650_v55 = vld [vmem:[%s4687_s8 + $0x128] ss:$28 sps:$4 sm:$0xff]  }
 0x385   :  { %v2462_v52 = vadd.f32 %v3381_v42, %v2451_v50  ;;  %v3652_v19 = vld [vmem:[%s4687_s8 + $0x12c] ss:$28 sps:$4 sm:$0xff]   ;;  %v3656_v43 = vld [vmem:[%s4687_s8 + $0x164] ss:$28 sps:$4 sm:$0xff]   ;;  %v3660_v47 = vld [vmem:[%s4687_s8 + $0x19c] ss:$28 sps:$4 sm:$0xff]  }
 0x386   :  { %v2461_v2 = vadd.f32 %v3381_v42, %v2450_v51  ;;  %v2464_v57 = vmax.f32 %v2460_v27, 0.0  ;;  %v3653_v42 = vld [vmem:[%s4687_s8 + $0x130] ss:$28 sps:$4 sm:$0xff]   ;;  %v3657_v44 = vld [vmem:[%s4687_s8 + $0x168] ss:$28 sps:$4 sm:$0xff]  }
 0x387   :  { %v2466_v58 = vmax.f32 %v2462_v52, 0.0  ;;  %v3654_v45 = vld [vmem:[%s4687_s8 + $0x160] ss:$28 sps:$4 sm:$0xff]   ;;  %v3658_v49 = vld [vmem:[%s4687_s8 + $0x198] ss:$28 sps:$4 sm:$0xff]  }
 0x388   :  { %v2465_v60 = vmax.f32 %v2461_v2, 0.0  ;;  %v2467_v59 = vpack.c.bf16 %v2464_v57, %v2463_v53  ;;  %v3661_v48 = vld [vmem:[%s4687_s8 + $0x1a0] ss:$28 sps:$4 sm:$0xff]  }
 0x38a   :  { %v2468_v62 = vpack.c.bf16 %v2466_v58, %v2465_v60  ;;  %3532 = vmatprep.mubr.bf16.mxu1 %v2467_v59 }
 0x38c   :  { %3533 = vmatmul.mubr.bf16.vlgmr.msra.gmra.mrb[80].mxu1 %v2468_v62 }
 0x38d   :  { %2994 = vmatpush1.bf16.msra.mxu1 %v3585_v61  ;;  %3025 = vmatprep.mubr.bf16.mxu1 %v3686_v8 }
 0x38e   :  { %2995 = vmatprep.subr.bf16.mxu1 %v3593_v56 }
 0x391   :  { %2996 = vmatpush1.bf16.msra.mxu1 %v3591_v1 }
 0x392   :  { %2997 = vmatprep.subr.bf16.mxu1 %v3599_v5 }
 0x395   :  { %2998 = vmatpush1.bf16.msra.mxu1 %v3597_v63 }
 0x396   :  { %2999 = vmatprep.subr.bf16.mxu1 %v3605_v3 }
 0x399   :  { %3000 = vmatpush1.bf16.msra.mxu1 %v3603_v4 }
 0x39a   :  { %3001 = vmatprep.subr.bf16.mxu1 %v3611_v9 }
 0x39d   :  { %3002 = vmatpush1.bf16.msra.mxu1 %v3609_v10 }
 0x39e   :  { %3003 = vmatprep.subr.bf16.mxu1 %v3617_v7 }
 0x3a1   :  { %3004 = vmatpush1.bf16.msra.mxu1 %v3615_v11 }
 0x3a2   :  { %3005 = vmatprep.subr.bf16.mxu1 %v3623_v12 }
 0x3a5   :  { %3006 = vmatpush1.bf16.msra.mxu1 %v3621_v0 }
 0x3a6   :  { %3007 = vmatprep.subr.bf16.mxu1 %v3629_v14 }
 0x3a9   :  { %3008 = vmatpush1.bf16.msra.mxu1 %v3627_v22 }
 0x3aa   :  { %3536 = vmatprep.subr.bf16.mxu1 %v3633_v17 }
 0x45f   :  { %v3534_v20 = vpop.f32.mrb[80].mxu1 }
 0x460   :  { %v2574_v23 = vpop.f32.mrb[81].mxu1  ;;  %v2583_v24 = vadd.f32 %v3534_v20, %v3382_v21 }
 0x461   :  { %v3535_v28 = vpop.f32.mrb[82].mxu1  ;;  %v2575_v6 = vadd.f32 %v3382_v21, %v2574_v23 }
 0x462   :  { %v2586_v46 = vadd.f32 %v3535_v28, %v3382_v21  ;;  %v2577_v25 = vpop.f32.mrb[83].mxu1 }
 0x463   :  { %v2578_v26 = vadd.f32 %v3382_v21, %v2577_v25 }
 0x464   :  { %v4581_v29 = vpack.c.bf16 %v2586_v46, %v2583_v24 }
 0x465   :  { %v2589_v18 = vpack.c.bf16 %v2578_v26, %v2575_v6 }
 0x467   :  { %2976 = vmatmul.mubr.bf16.vlgmr.msra.gmra.mrb[96].mxu0 %v2589_v18  ;;  %3026 = vmatmul.mubr.bf16.vlgmr.msra.gmra.mrb[84].mxu1 %v2589_v18 }
 0x468   :  { %3045 = vmatpush1.bf16.msra.mxu0 %v3630_v30  ;;  %3537 = vmatpush3.bf16.msra.mxu1 %v3633_v17 }
 0x469   :  { %3046 = vmatprep.subr.bf16.mxu0 %v3636_v31  ;;  %3538 = vmatprep.subr.bf16.mxu1 %v3637_v32 }
 0x46a   :  { %2984 = vmatprep.mubr.bf16.mxu0 %v3686_v8  ;;  %3035 = vmatprep.mubr.bf16.mxu1 %v3686_v8 }
 0x46c   :  { %3047 = vmatpush1.bf16.msra.mxu0 %v3634_v33  ;;  %3539 = vmatpush3.bf16.msra.mxu1 %v3637_v32 }
 0x46d   :  { %3048 = vmatprep.subr.bf16.mxu0 %v3640_v35  ;;  %3540 = vmatprep.subr.bf16.mxu1 %v3641_v34 }
 0x46f   :  { %2985 = vmatmul.mubr.bf16.gmra.mrb[100].mxu0 %v4581_v29  ;;  %3036 = vmatmul.mubr.bf16.gmra.mrb[88].mxu1 %v4581_v29 }
 0x470   :  { %3049 = vmatpush1.bf16.msra.mxu0 %v3638_v36  ;;  %3541 = vmatpush3.bf16.msra.mxu1 %v3641_v34 }
 0x471   :  { %3552 = vmatprep.mubr.bf16.mxu1 %v2589_v18  ;;  %3050 = vmatprep.subr.bf16.mxu0 %v3644_v54 }
 0x472   :  { %3542 = vmatprep.subr.bf16.mxu1 %v3645_v38  ;;  %3076 = vmatprep.mubr.bf16.mxu0 %v3686_v8 }
 0x474   :  { %3051 = vmatpush1.bf16.msra.mxu0 %v3642_v39  ;;  %3543 = vmatpush3.bf16.msra.mxu1 %v3645_v38 }
 0x475   :  { %3052 = vmatprep.subr.bf16.mxu0 %v3648_v40  ;;  %3544 = vmatprep.subr.bf16.mxu1 %v3649_v41 }
 0x478   :  { %3053 = vmatpush1.bf16.msra.mxu0 %v3646_v37  ;;  %3545 = vmatpush3.bf16.msra.mxu1 %v3649_v41 }
 0x479   :  { %3054 = vmatprep.subr.bf16.mxu0 %v3652_v19  ;;  %3546 = vmatprep.subr.bf16.mxu1 %v3653_v42 }
 0x47c   :  { %3055 = vmatpush1.bf16.msra.mxu0 %v3650_v55  ;;  %3547 = vmatpush3.bf16.msra.mxu1 %v3653_v42 }
 0x47d   :  { %3056 = vmatprep.subr.bf16.mxu0 %v3656_v43  ;;  %3548 = vmatprep.subr.bf16.mxu1 %v3657_v44 }
 0x480   :  { %3057 = vmatpush1.bf16.msra.mxu0 %v3654_v45  ;;  %3549 = vmatpush3.bf16.msra.mxu1 %v3657_v44 }
 0x481   :  { %3058 = vmatprep.subr.bf16.mxu0 %v3660_v47  ;;  %3550 = vmatprep.subr.bf16.mxu1 %v3661_v48 }
 0x484   :  { %3059 = vmatpush1.bf16.msra.mxu0 %v3658_v49  ;;  %3551 = vmatpush3.bf16.msra.mxu1 %v3661_v48 }
 0x487   :  { %3077 = vmatmul.mubr.bf16.vlgmr.msra.gmra.mrb[104].mxu0 %v2589_v18  ;;  %3553 = vmatmul.mubr.bf16.vlgmr.msra.gmra.mrb[92].mxu1 %v4581_v29 }
 0x488   :  { %3086 = vmatprep.mubr.bf16.mxu0 %v3686_v8 }
 0x48f   :  { %3087 = vmatmul.mubr.bf16.gmra.mrb[108].mxu0 %v4581_v29 }
 0x53a   :  { %v2977_v50 = vpop.f32.mrb[96].mxu0  ;;  %v3027_v51 = vpop.f32.mrb[84].mxu1 }
 0x53b   :  { %v2979_v27 = vpop.f32.mrb[97].mxu0  ;;  %v3029_v52 = vpop.f32.mrb[85].mxu1  ;;  %v3157_v57 = vrot.slane %v3027_v51, 2  ;;  %v3447_v51 = vld [vmem:[%s4688_s9] ss:$0 sm:$0xff] }
 0x53c   :  { %v2981_v2 = vpop.f32.mrb[98].mxu0  ;;  %v3031_v53 = vpop.f32.mrb[86].mxu1  ;;  %v3146_v61 = vrot.slane %v2979_v27, 1  ;;  %v3168_v62 = vrot.slane %v3029_v52, 3 }
 0x53d   :  { %v3158_v58 = vrot.slane %v3031_v53, 2  ;;  %v2982_v60 = vpop.f32.mrb[99].mxu0  ;;  %v3033_v59 = vpop.f32.mrb[87].mxu1 }
 0x53e   :  { %v3147_v56 = vrot.slane %v2982_v60, 1  ;;  %v3169_v1 = vrot.slane %v3033_v59, 3 }
 0x53f   :  { %v3159_v5 = vsel %vm1033_vm1, %v3157_v57, %v3158_v58 }
 0x540   :  { %v3148_v8 = vsel %vm953_vm0, %v3146_v61, %v3147_v56  ;;  %v3170_v63 = vsel %vm1113_vm2, %v3168_v62, %v3169_v1 }
 0x541   :  { %v3152_v3 = vadd.f32 %v3148_v8, %v2977_v50 }
 0x542   :  { %v2986_v4 = vpop.f32.mrb[100].mxu0  ;;  %v3037_v9 = vpop.f32.mrb[88].mxu1 }
 0x543   :  { %v3163_v10 = vadd.f32 %v3159_v5, %v3152_v3  ;;  %v2988_v7 = vpop.f32.mrb[101].mxu0  ;;  %v3039_v11 = vpop.f32.mrb[89].mxu1  ;;  %v3160_v16 = vrot.slane %v3037_v9, 2 }
 0x544   :  { %v3149_v12 = vrot.slane %v2988_v7, 1  ;;  %v2990_v0 = vpop.f32.mrb[102].mxu0  ;;  %v3041_v13 = vpop.f32.mrb[90].mxu1  ;;  %v3171_v21 = vrot.slane %v3039_v11, 3 }
 0x545   :  { %v3174_v14 = vadd.f32 %v3170_v63, %v3163_v10  ;;  %v2991_v15 = vpop.f32.mrb[103].mxu0  ;;  %v3042_v22 = vpop.f32.mrb[91].mxu1 }
 0x546   :  { %v3153_v17 = vadd.f32 %v3149_v12, %v2986_v4 }
 0x548   :  { %v3164_v20 = vadd.f32 %v3160_v16, %v3153_v17 }
 0x54a   :  { %v3175_v23 = vadd.f32 %v3171_v21, %v3164_v20 }
 0x55a   :  { %v3078_v28 = vpop.f32.mrb[104].mxu0  ;;  %v3554_v24 = vpop.f32.mrb[92].mxu1 }
 0x55b   :  { %v3080_v46 = vpop.f32.mrb[105].mxu0  ;;  %v3129_v25 = vpop.f32.mrb[93].mxu1  ;;  %v3179_v29 = vrot.slane %v3078_v28, 4  ;;  %v3204_v47 = vrot.slane %v3554_v24, 6 }
 0x55c   :  { %v3082_v6 = vpop.f32.mrb[106].mxu0  ;;  %v3555_v26 = vpop.f32.mrb[94].mxu1  ;;  %v3190_v32 = vrot.slane %v3080_v46, 5  ;;  %v3201_v33 = vrot.slane %v3129_v25, 6 }
 0x55d   :  { %v3180_v30 = vrot.slane %v3082_v6, 4  ;;  %v3084_v18 = vpop.f32.mrb[107].mxu0  ;;  %v3132_v31 = vpop.f32.mrb[95].mxu1 }
 0x55e   :  { %v3191_v35 = vrot.slane %v3084_v18, 5  ;;  %v3202_v34 = vrot.slane %v3132_v31, 6 }
 0x55f   :  { %v3181_v36 = vsel %vm1193_vm3, %v3179_v29, %v3180_v30 }
 0x560   :  { %v3185_v54 = vadd.f32 %v3181_v36, %v3174_v14  ;;  %v3192_v38 = vsel %vm1273_vm4, %v3190_v32, %v3191_v35  ;;  %v3203_v39 = vsel %vm1353_vm5, %v3201_v33, %v3202_v34 }
 0x562   :  { %v3196_v40 = vadd.f32 %v3192_v38, %v3185_v54  ;;  %v3088_v41 = vpop.f32.mrb[108].mxu0 }
 0x563   :  { %v3182_v37 = vrot.slane %v3088_v41, 4  ;;  %v3090_v19 = vpop.f32.mrb[109].mxu0 }
 0x564   :  { %v3207_v42 = vadd.f32 %v3203_v39, %v3196_v40  ;;  %v3193_v55 = vrot.slane %v3090_v19, 5  ;;  %v3092_v43 = vpop.f32.mrb[110].mxu0 }
 0x565   :  { %v3186_v44 = vadd.f32 %v3182_v37, %v3175_v23  ;;  %v3093_v45 = vpop.f32.mrb[111].mxu0 }
 0x567   :  { %v3197_v48 = vadd.f32 %v3193_v55, %v3186_v44 }
 0x569   :  { %v3208_v49 = vadd.f32 %v3204_v47, %v3197_v48 }
 0x56b   :  { %v3210_v50 = vrot.slane %v3208_v49, 7 }
 0x56d   :  { %v3212_v27 = vsel %vm1433_vm6, %v3207_v42, %v3210_v50 }
 0x56e   :  { %v3220_v52 = vadd.f32 %v3447_v51, %v3212_v27 }
 0x570   :  { %3221 = vst [vmem:[#allocation2] sm:$0x3] %v3220_v52 }
 0x571   :  { %3673 = shalt.err (!%p3670_p4)
}
 0x572   :  { %s3674_s19 = scalar_lea.hbm %s4689_s10, 32 }
 0x573   :  { %p3675_p5 = scmp.ne.s32.totalorder %s4689_s10, %s3674_s19  ;;  %p3678_p6 = scmp.lt.u32.totalorder %s3674_s19, %s4689_s10 }
 0x575   :  { %p3680_p7 = pnand %p3678_p6, %p3675_p5 }
 0x577   :  { %3683 = shalt.err (!%p3680_p7)
}
 0x578   :  { %3231 = dma.vmem_to_hbm [thread:$0]  %s3229_s6, 32, %s4689_s10, [#allocation3]  }
 0x579   :  { %3684 = dma.done.wait [#allocation3], 32  }
 0x57a   :  { %3685 = vsyncadd [#allocation3], 4294967264 }
 0x57b   :  { %3235 = vsyncpa [#allocation3], 1 }

</bundles_post_ra>
